<compile_context>
chip_gen: v7x
topology: tpu7x:2x2x1
jax: 0.10.0
libtpu: 0.0.40
codegen_flags: <defaults>
</compile_context>

<pallas_src>
import functools
import math

import jax
import jax.numpy as jnp
from jax.experimental import pallas as pl
from jax.experimental.pallas import tpu as pltpu


# ----------------------------- in-kernel helpers -----------------------------

def _ln(x, g, b, eps=1e-5):
    # PyTorch nn.LayerNorm: biased variance, eps inside rsqrt.  f32 math.
    mu = jnp.mean(x, axis=-1, keepdims=True)
    var = jnp.mean((x - mu) * (x - mu), axis=-1, keepdims=True)
    return (x - mu) * jax.lax.rsqrt(var + eps) * g + b


def _gelu(x):
    # TODO(synk): F.gelu defaults to exact erf; tanh approximation used in-kernel
    # (EUP tanh co-issues with VALU work), ~1e-3 divergence.
    return 0.5 * x * (1.0 + jnp.tanh(0.7978845608028654 * (x + 0.044715 * x * x * x)))


def _round_up(x, m):
    return (x + m - 1) // m * m


# --------------------------- fused transformer stack ---------------------------

def _stack_kernel(x_ref,
                  ln1g_ref, ln1b_ref, wqkv_ref, bqkv_ref, wp_ref, bp_ref,
                  ln2g_ref, ln2b_ref, w1_ref, b1_ref, w2_ref, b2_ref,
                  o_ref, *, n_head, batch):
    l = pl.program_id(0)

    # residual stream lives in the (constant-index) output block across layers
    @pl.when(l == 0)
    def _():
        o_ref[...] = x_ref[...]

    m, c = o_ref.shape                 # m = B * T_pad (T_pad % 8 == 0)
    t = m // batch
    hd = c // n_head
    scale = 1.0 / math.sqrt(hd)
    bf16 = jnp.bfloat16

    x = o_ref[...]                     # (M, C) f32

    # ---- attention: LN1 -> fused QKV (batch folded into M) ----
    h = _ln(x, ln1g_ref[0], ln1b_ref[0])
    qkv = jnp.dot(h.astype(bf16), wqkv_ref[0],
                  preferred_element_type=jnp.float32) + bqkv_ref[0]       # (M, 3C)
    qkv = qkv.reshape(batch, t, 3 * c)                                    # free: t % 8 == 0

    def heads(base):                    # -> (n_head*B, T, hd), head-major on axis 0
        return jnp.concatenate(
            [qkv[:, :, base + hh * hd: base + (hh + 1) * hd] for hh in range(n_head)],
            axis=0)
    qh, kh, vh = heads(0), heads(c), heads(2 * c)

    # scores, batched over (head, batch)
    att = jax.lax.dot_general(qh.astype(bf16), kh.astype(bf16),
                              (((2,), (2,)), ((0,), (0,))),
                              preferred_element_type=jnp.float32) * scale  # (nh*B,T,T)
    row = jax.lax.broadcasted_iota(jnp.int32, (1, t, t), 1)
    col = jax.lax.broadcasted_iota(jnp.int32, (1, t, t), 2)
    att = att + jnp.where(row >= col, 0.0, -1e30)          # single (1,T,T) mask addend
    p = jnp.exp(att - jnp.max(att, axis=-1, keepdims=True))
    p = p * pl.reciprocal(jnp.sum(p, axis=-1, keepdims=True), approx=True)

    y = jax.lax.dot_general(p.astype(bf16), vh.astype(bf16),
                            (((2,), (1,)), ((0,), (0,))),
                            preferred_element_type=jnp.float32)            # (nh*B,T,hd)
    # heads back onto the lane axis (head-major, matching torch's view(B,T,C))
    ycat = jnp.concatenate([y[hh * batch:(hh + 1) * batch] for hh in range(n_head)],
                           axis=-1)                                        # (B,T,C)
    proj = jnp.dot(ycat.reshape(m, c).astype(bf16), wp_ref[0],
                   preferred_element_type=jnp.float32) + bp_ref[0]         # one K=C matmul
    x = x + proj

    # ---- MLP ----
    h2 = _ln(x, ln2g_ref[0], ln2b_ref[0])
    a = _gelu(jnp.dot(h2.astype(bf16), w1_ref[0],
                      preferred_element_type=jnp.float32) + b1_ref[0])
    mlp = jnp.dot(a.astype(bf16), w2_ref[0],
                  preferred_element_type=jnp.float32) + b2_ref[0]
    o_ref[...] = x + mlp


def transformer_stack(x2d, sp, n_head, batch):
    m, c = x2d.shape
    n_layer = sp["w_qkv"].shape[0]
    hdim = 4 * c

    def wspec(shape):   # per-layer stacked weight: block (1, *shape), indexed by layer
        nd = len(shape)
        return pl.BlockSpec((1,) + shape, lambda l, _nd=nd: (l,) + (0,) * _nd)

    return pl.pallas_call(
        functools.partial(_stack_kernel, n_head=n_head, batch=batch),
        out_shape=jax.ShapeDtypeStruct((m, c), jnp.float32),
        grid=(n_layer,),
        in_specs=[
            pl.BlockSpec((m, c), lambda l: (0, 0)),         # activations (fetched once)
            wspec((1, c)), wspec((1, c)),                   # ln1
            wspec((c, 3 * c)), wspec((1, 3 * c)),           # fused qkv
            wspec((c, c)), wspec((1, c)),                   # attn out proj
            wspec((1, c)), wspec((1, c)),                   # ln2
            wspec((c, hdim)), wspec((1, hdim)),             # mlp fc
            wspec((hdim, c)), wspec((1, c)),                # mlp proj
        ],
        out_specs=pl.BlockSpec((m, c), lambda l: (0, 0)),   # resident across layers
        compiler_params=pltpu.CompilerParams(
            dimension_semantics=("arbitrary",)),
    )(x2d, sp["ln1_g"], sp["ln1_b"], sp["w_qkv"], sp["b_qkv"],
      sp["w_proj"], sp["b_proj"], sp["ln2_g"], sp["ln2_b"],
      sp["w1"], sp["b1"], sp["w2"], sp["b2"])


# --------------------------- final LayerNorm + head ----------------------------

def _lnf_head_kernel(x_ref, g_ref, b_ref, w_ref, o_ref):
    h = _ln(x_ref[...], g_ref[...], b_ref[...])
    o_ref[...] = jnp.dot(h.astype(jnp.bfloat16), w_ref[...],
                         preferred_element_type=jnp.float32)


def lnf_head(x2d, g, b, w_head, row_tile=256, vocab_tile=2048):
    """ln_f + vocab head on state-token rows; tiled over rows and vocab (128-padded)."""
    n, c = x2d.shape
    v = w_head.shape[1]
    tn = min(vocab_tile, _round_up(v, 128))
    v_pad = _round_up(v, tn)
    if v_pad != v:
        w_head = jnp.pad(w_head, ((0, 0), (0, v_pad - v)))
    tm = min(row_tile, _round_up(n, 8))
    n_pad = _round_up(n, tm)
    if n_pad != n:
        x2d = jnp.pad(x2d, ((0, n_pad - n), (0, 0)))
    out = pl.pallas_call(
        _lnf_head_kernel,
        out_shape=jax.ShapeDtypeStruct((n_pad, v_pad), jnp.float32),
        grid=(n_pad // tm, v_pad // tn),
        in_specs=[pl.BlockSpec((tm, c), lambda i, j: (i, 0)),
                  pl.BlockSpec((1, c), lambda i, j: (0, 0)),
                  pl.BlockSpec((1, c), lambda i, j: (0, 0)),
                  pl.BlockSpec((c, tn), lambda i, j: (0, j))],
        out_specs=pl.BlockSpec((tm, tn), lambda i, j: (i, j)),
        compiler_params=pltpu.CompilerParams(
            dimension_semantics=("parallel", "parallel")),
    )(x2d, g, b, w_head)
    return out[:n, :v]


# ------------------------------- parameters -----------------------------------

def init_params(key, *, n_embd, n_head, n_layer, vocab_size, observation_size,
                block_size, max_timestep):
    C = n_embd
    H = 4 * C
    keys = iter(jax.random.split(key, 8 + 8 * n_layer))

    def w(shape):
        return jax.random.normal(next(keys), shape, jnp.float32) * 0.02

    params = {
        "pos_emb": jnp.zeros((1, block_size * 3 + 1, C), jnp.float32),
        "global_pos_emb": jnp.zeros((1, max_timestep + 1, C), jnp.float32),
        "W_state": w((observation_size, C)),
        "b_state": jnp.zeros((C,), jnp.float32),
        "W_ret": w((1, C)),
        "b_ret": jnp.zeros((C,), jnp.float32),
        "W_act_emb": w((vocab_size, C)),
        "lnf_g": jnp.ones((1, C), jnp.float32),
        "lnf_b": jnp.zeros((1, C), jnp.float32),
        "W_head": w((C, vocab_size)).astype(jnp.bfloat16),   # bf16 MXU weight
    }

    ln1_g, ln1_b, ln2_g, ln2_b = [], [], [], []
    wqkv, bqkv, wproj, bproj, w1s, b1s, w2s, b2s = [], [], [], [], [], [], [], []
    for _ in range(n_layer):
        wq, wk, wv = w((C, C)), w((C, C)), w((C, C))
        wqkv.append(jnp.concatenate([wq, wk, wv], axis=1))        # (C, 3C) fused
        bqkv.append(jnp.zeros((1, 3 * C), jnp.float32))
        wproj.append(w((C, C)))
        bproj.append(jnp.zeros((1, C), jnp.float32))
        ln1_g.append(jnp.ones((1, C), jnp.float32)); ln1_b.append(jnp.zeros((1, C), jnp.float32))
        ln2_g.append(jnp.ones((1, C), jnp.float32)); ln2_b.append(jnp.zeros((1, C), jnp.float32))
        w1s.append(w((C, H))); b1s.append(jnp.zeros((1, H), jnp.float32))
        w2s.append(w((H, C))); b2s.append(jnp.zeros((1, C), jnp.float32))

    params["stack"] = {   # per-layer weights stacked on a leading layer axis
        "ln1_g": jnp.stack(ln1_g), "ln1_b": jnp.stack(ln1_b),
        "w_qkv": jnp.stack(wqkv).astype(jnp.bfloat16), "b_qkv": jnp.stack(bqkv),
        "w_proj": jnp.stack(wproj).astype(jnp.bfloat16), "b_proj": jnp.stack(bproj),
        "ln2_g": jnp.stack(ln2_g), "ln2_b": jnp.stack(ln2_b),
        "w1": jnp.stack(w1s).astype(jnp.bfloat16), "b1": jnp.stack(b1s),
        "w2": jnp.stack(w2s).astype(jnp.bfloat16), "b2": jnp.stack(b2s),
    }
    return params


# -------------------------------- forward -------------------------------------

def gpt_forward(params, states, actions, targets, rtgs, timesteps, *,
                n_embd, n_head, vocab_size):
    B, T = states.shape[0], states.shape[1]
    C = n_embd

    # tiny encoders / gathers in plain XLA (Pallas launch overhead would dominate)
    s_in = states.reshape(-1, 128).astype(jnp.float32)
    state_emb = jnp.tanh(s_in @ params["W_state"] + params["b_state"]).reshape(B, T, C)
    rtg_emb = jnp.tanh(rtgs.astype(jnp.float32) * params["W_ret"][0] + params["b_ret"])
    act_idx = actions.astype(jnp.int32).squeeze(-1)
    action_emb = jnp.tanh(params["W_act_emb"][act_idx])

    # interleave [rtg, state, action] * T (no strided scatters)
    T_tok = 3 * T
    tok = jnp.stack([rtg_emb, state_emb, action_emb], axis=2).reshape(B, T_tok, C)

    ts = timesteps[:, 0, 0].astype(jnp.int32)
    global_pe = params["global_pos_emb"][0][ts][:, None, :]
    pos = global_pe + params["pos_emb"][:, :T_tok, :]
    x = tok + pos                                   # embd dropout = identity

    # pad token axis to a multiple of 8 (sublane-dense, free in-kernel reshapes);
    # pad rows are trailing so causal masking keeps them out of real rows
    T_pad = _round_up(T_tok, 8)
    if T_pad != T_tok:
        x = jnp.pad(x, ((0, 0), (0, T_pad - T_tok), (0, 0)))
    x2d = x.reshape(B * T_pad, C)

    x2d = transformer_stack(x2d, params["stack"], n_head, B)
    x = x2d.reshape(B, T_pad, C)[:, :T_tok, :]

    # head only on state-token rows (== logits[:, 1::3, :] in the torch module)
    x_state = x[:, 1::3, :].reshape(B * T, C)
    logits = lnf_head(x_state, params["lnf_g"], params["lnf_b"], params["W_head"])
    logits = logits.reshape(B, T, vocab_size)

    loss = None
    if targets is not None:
        tflat = targets.reshape(-1).astype(jnp.int32)
        logp = jax.nn.log_softmax(logits.reshape(-1, vocab_size), axis=-1)
        loss = -jnp.mean(jnp.take_along_axis(logp, tflat[:, None], axis=1))
    return logits, loss


# ---------------------------------- main ---------------------------------------

if __name__ == "__main__":
    B, T = 2, 4                      # batch, context timesteps
    n_embd, n_head, n_layer = 32, 4, 2
    vocab_size = 16
    observation_size = 128           # forward hard-codes reshape(-1, 128)
    max_timestep = 20
    block_size = T

    key = jax.random.PRNGKey(0)
    kp, ks, ka, kr, kt = jax.random.split(key, 5)

    params = init_params(kp, n_embd=n_embd, n_head=n_head, n_layer=n_layer,
                         vocab_size=vocab_size, observation_size=observation_size,
                         block_size=block_size, max_timestep=max_timestep)

    states = jax.random.normal(ks, (B, T, observation_size), jnp.float32)
    actions = jax.random.randint(ka, (B, T, 1), 0, vocab_size, jnp.int32)
    rtgs = jax.random.normal(kr, (B, T, 1), jnp.float32)
    timesteps = jax.random.randint(kt, (B, 1, 1), 0, max_timestep + 1, jnp.int32)
    targets = actions

    fwd = jax.jit(functools.partial(gpt_forward, n_embd=n_embd, n_head=n_head,
                                    vocab_size=vocab_size))
    logits, loss = fwd(params, states, actions, targets, rtgs, timesteps)
    (logits, loss) = jax.block_until_ready((logits, loss))

    assert logits.shape == (B, T, vocab_size), logits.shape
    assert bool(jnp.isfinite(logits).all()) and bool(jnp.isfinite(loss))
    print("KERNEL_OK")
</pallas_src>

<mosaic_0001>
module attributes {stable_mosaic.version = 11 : i64} {
  func.func @_lnf_head_kernel(%arg0: i32, %arg1: i32, %arg2: memref<8x32xf32, #tpu.memory_space<vmem>>, %arg3: memref<1x32xf32, #tpu.memory_space<vmem>>, %arg4: memref<1x32xf32, #tpu.memory_space<vmem>>, %arg5: memref<32x128xbf16, #tpu.memory_space<vmem>>, %arg6: memref<8x128xf32, #tpu.memory_space<vmem>>) attributes {dimension_semantics = [#tpu.dimension_semantics<parallel>, #tpu.dimension_semantics<parallel>], iteration_bounds = array<i64: 1, 1>, scalar_prefetch = 0 : i64, scratch_operands = 0 : i64, tpu.core_type = #tpu.core_type<tc>, window_params = [{transform_indices = @transform_0, window_bounds = array<i64: 8, 32>}, {pipeline_mode = #tpu.pipeline_mode<synchronous>, transform_indices = @transform_1, window_bounds = array<i64: 1, 32>}, {pipeline_mode = #tpu.pipeline_mode<synchronous>, transform_indices = @transform_2, window_bounds = array<i64: 1, 32>}, {transform_indices = @transform_3, window_bounds = array<i64: 32, 128>}, {transform_indices = @transform_4, window_bounds = array<i64: 8, 128>}]} {
    %c0 = arith.constant 0 : index
    %c0_0 = arith.constant 0 : index
    %0 = vector.load %arg2[%c0, %c0_0] : memref<8x32xf32, #tpu.memory_space<vmem>>, vector<8x32xf32>
    %c0_1 = arith.constant 0 : index
    %c0_2 = arith.constant 0 : index
    %1 = vector.load %arg3[%c0_1, %c0_2] : memref<1x32xf32, #tpu.memory_space<vmem>>, vector<1x32xf32>
    %c0_3 = arith.constant 0 : index
    %c0_4 = arith.constant 0 : index
    %2 = vector.load %arg4[%c0_3, %c0_4] : memref<1x32xf32, #tpu.memory_space<vmem>>, vector<1x32xf32>
    %cst = arith.constant dense<0.000000e+00> : vector<8xf32>
    %3 = vector.multi_reduction <add>, %0, %cst [1] : vector<8x32xf32> to vector<8xf32>
    %4 = vector.shape_cast %3 : vector<8xf32> to vector<8x1xf32>
    %cst_5 = arith.constant 3.200000e+01 : f32
    %5 = vector.broadcast %cst_5 : f32 to vector<8x1xf32>
    %6 = arith.divf %4, %5 : vector<8x1xf32>
    %7 = vector.broadcast %6 : vector<8x1xf32> to vector<8x32xf32>
    %8 = arith.subf %0, %7 : vector<8x32xf32>
    %9 = vector.broadcast %6 : vector<8x1xf32> to vector<8x32xf32>
    %10 = arith.subf %0, %9 : vector<8x32xf32>
    %11 = arith.mulf %8, %10 : vector<8x32xf32>
    %cst_6 = arith.constant dense<0.000000e+00> : vector<8xf32>
    %12 = vector.multi_reduction <add>, %11, %cst_6 [1] : vector<8x32xf32> to vector<8xf32>
    %13 = vector.shape_cast %12 : vector<8xf32> to vector<8x1xf32>
    %cst_7 = arith.constant 3.200000e+01 : f32
    %14 = vector.broadcast %cst_7 : f32 to vector<8x1xf32>
    %15 = arith.divf %13, %14 : vector<8x1xf32>
    %16 = vector.broadcast %6 : vector<8x1xf32> to vector<8x32xf32>
    %17 = arith.subf %0, %16 : vector<8x32xf32>
    %cst_8 = arith.constant 9.99999974E-6 : f32
    %18 = vector.broadcast %cst_8 : f32 to vector<8x1xf32>
    %19 = arith.addf %15, %18 : vector<8x1xf32>
    %20 = math.rsqrt %19 : vector<8x1xf32>
    %21 = vector.broadcast %20 : vector<8x1xf32> to vector<8x32xf32>
    %22 = arith.mulf %17, %21 : vector<8x32xf32>
    %23 = vector.broadcast %1 : vector<1x32xf32> to vector<8x32xf32>
    %24 = arith.mulf %22, %23 : vector<8x32xf32>
    %25 = vector.broadcast %2 : vector<1x32xf32> to vector<8x32xf32>
    %26 = arith.addf %24, %25 : vector<8x32xf32>
    %27 = arith.truncf %26 : vector<8x32xf32> to vector<8x32xbf16>
    %c0_9 = arith.constant 0 : index
    %c0_10 = arith.constant 0 : index
    %28 = vector.load %arg5[%c0_9, %c0_10] : memref<32x128xbf16, #tpu.memory_space<vmem>>, vector<32x128xbf16>
    %cst_11 = arith.constant dense<0.000000e+00> : vector<8x128xf32>
    %29 = tpu.matmul %27, %28, %cst_11 {dimension_numbers = #tpu.dot_dimension_numbers<[1], [0], [0], [1], [0, 0, 1, 1], [], []>} : vector<8x32xbf16>, vector<32x128xbf16>, vector<8x128xf32> -> vector<8x128xf32>
    %c0_12 = arith.constant 0 : index
    %c0_13 = arith.constant 0 : index
    %30 = vector.load %arg6[%c0_12, %c0_13] : memref<8x128xf32, #tpu.memory_space<vmem>>, vector<8x128xf32>
    tpu.vector_store %arg6[%c0_12, %c0_13], %29 {strides = array<i32>} : memref<8x128xf32, #tpu.memory_space<vmem>>, vector<8x128xf32>,
    return
  }
  func.func @transform_0(%arg0: i32, %arg1: i32) -> (i32, i32) {
    %c0_i32 = arith.constant 0 : i32
    %c0_i32_0 = arith.constant 0 : i32
    return %arg0, %c0_i32 : i32, i32
  }
  func.func @transform_1(%arg0: i32, %arg1: i32) -> (i32, i32) {
    %c0_i32 = arith.constant 0 : i32
    %c0_i32_0 = arith.constant 0 : i32
    %c0_i32_1 = arith.constant 0 : i32
    return %c0_i32, %c0_i32_0 : i32, i32
  }
  func.func @transform_2(%arg0: i32, %arg1: i32) -> (i32, i32) {
    %c0_i32 = arith.constant 0 : i32
    %c0_i32_0 = arith.constant 0 : i32
    %c0_i32_1 = arith.constant 0 : i32
    return %c0_i32, %c0_i32_0 : i32, i32
  }
  func.func @transform_3(%arg0: i32, %arg1: i32) -> (i32, i32) {
    %c0_i32 = arith.constant 0 : i32
    %c0_i32_0 = arith.constant 0 : i32
    return %c0_i32, %arg1 : i32, i32
  }
  func.func @transform_4(%arg0: i32, %arg1: i32) -> (i32, i32) {
    %c0_i32 = arith.constant 0 : i32
    return %arg0, %arg1 : i32, i32
  }
}

module attributes {stable_mosaic.version = 11 : i64} {
  func.func @_stack_kernel(%arg0: i32, %arg1: memref<32x32xf32, #tpu.memory_space<vmem>>, %arg2: memref<1x1x32xf32, #tpu.memory_space<vmem>>, %arg3: memref<1x1x32xf32, #tpu.memory_space<vmem>>, %arg4: memref<1x32x96xbf16, #tpu.memory_space<vmem>>, %arg5: memref<1x1x96xf32, #tpu.memory_space<vmem>>, %arg6: memref<1x32x32xbf16, #tpu.memory_space<vmem>>, %arg7: memref<1x1x32xf32, #tpu.memory_space<vmem>>, %arg8: memref<1x1x32xf32, #tpu.memory_space<vmem>>, %arg9: memref<1x1x32xf32, #tpu.memory_space<vmem>>, %arg10: memref<1x32x128xbf16, #tpu.memory_space<vmem>>, %arg11: memref<1x1x128xf32, #tpu.memory_space<vmem>>, %arg12: memref<1x128x32xbf16, #tpu.memory_space<vmem>>, %arg13: memref<1x1x32xf32, #tpu.memory_space<vmem>>, %arg14: memref<32x32xf32, #tpu.memory_space<vmem>>) attributes {dimension_semantics = [#tpu.dimension_semantics<arbitrary>], iteration_bounds = array<i64: 2>, scalar_prefetch = 0 : i64, scratch_operands = 0 : i64, tpu.core_type = #tpu.core_type<tc>, window_params = [{pipeline_mode = #tpu.pipeline_mode<synchronous>, transform_indices = @transform_0, window_bounds = array<i64: 32, 32>}, {transform_indices = @transform_1, window_bounds = array<i64: 1, 1, 32>}, {transform_indices = @transform_2, window_bounds = array<i64: 1, 1, 32>}, {transform_indices = @transform_3, window_bounds = array<i64: 1, 32, 96>}, {transform_indices = @transform_4, window_bounds = array<i64: 1, 1, 96>}, {transform_indices = @transform_5, window_bounds = array<i64: 1, 32, 32>}, {transform_indices = @transform_6, window_bounds = array<i64: 1, 1, 32>}, {transform_indices = @transform_7, window_bounds = array<i64: 1, 1, 32>}, {transform_indices = @transform_8, window_bounds = array<i64: 1, 1, 32>}, {transform_indices = @transform_9, window_bounds = array<i64: 1, 32, 128>}, {transform_indices = @transform_10, window_bounds = array<i64: 1, 1, 128>}, {transform_indices = @transform_11, window_bounds = array<i64: 1, 128, 32>}, {transform_indices = @transform_12, window_bounds = array<i64: 1, 1, 32>}, {pipeline_mode = #tpu.pipeline_mode<synchronous>, transform_indices = @transform_13, window_bounds = array<i64: 32, 32>}]} {
    %c0_i32 = arith.constant 0 : i32
    %0 = arith.cmpi eq, %arg0, %c0_i32 : i32
    %1 = arith.extui %0 : i1 to i32
    %c0_i32_0 = arith.constant 0 : i32
    %2 = arith.cmpi ne, %1, %c0_i32_0 : i32
    scf.if %2 {
      %c0_64 = arith.constant 0 : index
      %c0_65 = arith.constant 0 : index
      %156 = vector.load %arg1[%c0_64, %c0_65] : memref<32x32xf32, #tpu.memory_space<vmem>>, vector<32x32xf32>
      %c0_66 = arith.constant 0 : index
      %c0_67 = arith.constant 0 : index
      %157 = vector.load %arg14[%c0_66, %c0_67] : memref<32x32xf32, #tpu.memory_space<vmem>>, vector<32x32xf32>
      tpu.vector_store %arg14[%c0_66, %c0_67], %156 {strides = array<i32>} : memref<32x32xf32, #tpu.memory_space<vmem>>, vector<32x32xf32>,
    } else {
    }
    %c0 = arith.constant 0 : index
    %c0_1 = arith.constant 0 : index
    %3 = vector.load %arg14[%c0, %c0_1] : memref<32x32xf32, #tpu.memory_space<vmem>>, vector<32x32xf32>
    %c0_2 = arith.constant 0 : index
    %c0_3 = arith.constant 0 : index
    %c0_4 = arith.constant 0 : index
    %4 = vector.load %arg2[%c0_2, %c0_3, %c0_4] : memref<1x1x32xf32, #tpu.memory_space<vmem>>, vector<1x1x32xf32>
    %5 = vector.shape_cast %4 : vector<1x1x32xf32> to vector<1x32xf32>
    %c0_5 = arith.constant 0 : index
    %c0_6 = arith.constant 0 : index
    %c0_7 = arith.constant 0 : index
    %6 = vector.load %arg3[%c0_5, %c0_6, %c0_7] : memref<1x1x32xf32, #tpu.memory_space<vmem>>, vector<1x1x32xf32>
    %7 = vector.shape_cast %6 : vector<1x1x32xf32> to vector<1x32xf32>
    %cst = arith.constant dense<0.000000e+00> : vector<32xf32>
    %8 = vector.multi_reduction <add>, %3, %cst [1] : vector<32x32xf32> to vector<32xf32>
    %9 = vector.shape_cast %8 : vector<32xf32> to vector<32x1xf32>
    %cst_8 = arith.constant 3.200000e+01 : f32
    %10 = vector.broadcast %cst_8 : f32 to vector<32x1xf32>
    %11 = arith.divf %9, %10 : vector<32x1xf32>
    %12 = vector.broadcast %11 : vector<32x1xf32> to vector<32x32xf32>
    %13 = arith.subf %3, %12 : vector<32x32xf32>
    %14 = vector.broadcast %11 : vector<32x1xf32> to vector<32x32xf32>
    %15 = arith.subf %3, %14 : vector<32x32xf32>
    %16 = arith.mulf %13, %15 : vector<32x32xf32>
    %cst_9 = arith.constant dense<0.000000e+00> : vector<32xf32>
    %17 = vector.multi_reduction <add>, %16, %cst_9 [1] : vector<32x32xf32> to vector<32xf32>
    %18 = vector.shape_cast %17 : vector<32xf32> to vector<32x1xf32>
    %cst_10 = arith.constant 3.200000e+01 : f32
    %19 = vector.broadcast %cst_10 : f32 to vector<32x1xf32>
    %20 = arith.divf %18, %19 : vector<32x1xf32>
    %21 = vector.broadcast %11 : vector<32x1xf32> to vector<32x32xf32>
    %22 = arith.subf %3, %21 : vector<32x32xf32>
    %cst_11 = arith.constant 9.99999974E-6 : f32
    %23 = vector.broadcast %cst_11 : f32 to vector<32x1xf32>
    %24 = arith.addf %20, %23 : vector<32x1xf32>
    %25 = math.rsqrt %24 : vector<32x1xf32>
    %26 = vector.broadcast %25 : vector<32x1xf32> to vector<32x32xf32>
    %27 = arith.mulf %22, %26 : vector<32x32xf32>
    %28 = vector.broadcast %5 : vector<1x32xf32> to vector<32x32xf32>
    %29 = arith.mulf %27, %28 : vector<32x32xf32>
    %30 = vector.broadcast %7 : vector<1x32xf32> to vector<32x32xf32>
    %31 = arith.addf %29, %30 : vector<32x32xf32>
    %32 = arith.truncf %31 : vector<32x32xf32> to vector<32x32xbf16>
    %c0_12 = arith.constant 0 : index
    %c0_13 = arith.constant 0 : index
    %c0_14 = arith.constant 0 : index
    %33 = vector.load %arg4[%c0_12, %c0_13, %c0_14] : memref<1x32x96xbf16, #tpu.memory_space<vmem>>, vector<1x32x96xbf16>
    %34 = vector.shape_cast %33 : vector<1x32x96xbf16> to vector<32x96xbf16>
    %cst_15 = arith.constant dense<0.000000e+00> : vector<32x96xf32>
    %35 = tpu.matmul %32, %34, %cst_15 {dimension_numbers = #tpu.dot_dimension_numbers<[1], [0], [0], [1], [0, 0, 1, 1], [], []>} : vector<32x32xbf16>, vector<32x96xbf16>, vector<32x96xf32> -> vector<32x96xf32>
    %c0_16 = arith.constant 0 : index
    %c0_17 = arith.constant 0 : index
    %c0_18 = arith.constant 0 : index
    %36 = vector.load %arg5[%c0_16, %c0_17, %c0_18] : memref<1x1x96xf32, #tpu.memory_space<vmem>>, vector<1x1x96xf32>
    %37 = vector.shape_cast %36 : vector<1x1x96xf32> to vector<1x96xf32>
    %38 = vector.broadcast %37 : vector<1x96xf32> to vector<32x96xf32>
    %39 = arith.addf %35, %38 : vector<32x96xf32>
    %40 = vector.shape_cast %39 : vector<32x96xf32> to vector<2x16x96xf32>
    %41 = vector.extract_strided_slice %40 {offsets = [0, 0, 0], sizes = [2, 16, 8], strides = [1, 1, 1]} : vector<2x16x96xf32> to vector<2x16x8xf32>
    %42 = vector.extract_strided_slice %40 {offsets = [0, 0, 8], sizes = [2, 16, 8], strides = [1, 1, 1]} : vector<2x16x96xf32> to vector<2x16x8xf32>
    %43 = vector.extract_strided_slice %40 {offsets = [0, 0, 16], sizes = [2, 16, 8], strides = [1, 1, 1]} : vector<2x16x96xf32> to vector<2x16x8xf32>
    %44 = vector.extract_strided_slice %40 {offsets = [0, 0, 24], sizes = [2, 16, 8], strides = [1, 1, 1]} : vector<2x16x96xf32> to vector<2x16x8xf32>
    %45 = tpu.concatenate %41, %42, %43, %44 in 0 : vector<2x16x8xf32>, vector<2x16x8xf32>, vector<2x16x8xf32>, vector<2x16x8xf32> -> vector<8x16x8xf32>
    %46 = vector.extract_strided_slice %40 {offsets = [0, 0, 32], sizes = [2, 16, 8], strides = [1, 1, 1]} : vector<2x16x96xf32> to vector<2x16x8xf32>
    %47 = vector.extract_strided_slice %40 {offsets = [0, 0, 40], sizes = [2, 16, 8], strides = [1, 1, 1]} : vector<2x16x96xf32> to vector<2x16x8xf32>
    %48 = vector.extract_strided_slice %40 {offsets = [0, 0, 48], sizes = [2, 16, 8], strides = [1, 1, 1]} : vector<2x16x96xf32> to vector<2x16x8xf32>
    %49 = vector.extract_strided_slice %40 {offsets = [0, 0, 56], sizes = [2, 16, 8], strides = [1, 1, 1]} : vector<2x16x96xf32> to vector<2x16x8xf32>
    %50 = tpu.concatenate %46, %47, %48, %49 in 0 : vector<2x16x8xf32>, vector<2x16x8xf32>, vector<2x16x8xf32>, vector<2x16x8xf32> -> vector<8x16x8xf32>
    %51 = vector.extract_strided_slice %40 {offsets = [0, 0, 64], sizes = [2, 16, 8], strides = [1, 1, 1]} : vector<2x16x96xf32> to vector<2x16x8xf32>
    %52 = vector.extract_strided_slice %40 {offsets = [0, 0, 72], sizes = [2, 16, 8], strides = [1, 1, 1]} : vector<2x16x96xf32> to vector<2x16x8xf32>
    %53 = vector.extract_strided_slice %40 {offsets = [0, 0, 80], sizes = [2, 16, 8], strides = [1, 1, 1]} : vector<2x16x96xf32> to vector<2x16x8xf32>
    %54 = vector.extract_strided_slice %40 {offsets = [0, 0, 88], sizes = [2, 16, 8], strides = [1, 1, 1]} : vector<2x16x96xf32> to vector<2x16x8xf32>
    %55 = tpu.concatenate %51, %52, %53, %54 in 0 : vector<2x16x8xf32>, vector<2x16x8xf32>, vector<2x16x8xf32>, vector<2x16x8xf32> -> vector<8x16x8xf32>
    %56 = arith.truncf %45 : vector<8x16x8xf32> to vector<8x16x8xbf16>
    %57 = arith.truncf %50 : vector<8x16x8xf32> to vector<8x16x8xbf16>
    %cst_19 = arith.constant dense<0.000000e+00> : vector<8x16x16xf32>
    %58 = tpu.matmul %56, %57, %cst_19 {dimension_numbers = #tpu.dot_dimension_numbers<[2], [2], [1], [1], [0, 0, 0, 1, 1, 1], [0], [0]>} : vector<8x16x8xbf16>, vector<8x16x8xbf16>, vector<8x16x16xf32> -> vector<8x16x16xf32>
    %cst_20 = arith.constant 0.353553385 : f32
    %59 = vector.broadcast %cst_20 : f32 to vector<8x16x16xf32>
    %60 = arith.mulf %58, %59 : vector<8x16x16xf32>
    %61 = tpu.iota {dimensions = array<i32: 1>} : vector<1x16x16xi32>
    %62 = tpu.iota {dimensions = array<i32: 2>} : vector<1x16x16xi32>
    %63 = arith.cmpi sge, %61, %62 : vector<1x16x16xi32>
    %cst_21 = arith.constant 0.000000e+00 : f32
    %cst_22 = arith.constant -1.000000e+30 : f32
    %64 = vector.broadcast %cst_21 : f32 to vector<1x16x16xf32>
    %65 = vector.broadcast %cst_22 : f32 to vector<1x16x16xf32>
    %66 = arith.select %63, %64, %65 : vector<1x16x16xi1>, vector<1x16x16xf32>
    %67 = vector.broadcast %66 : vector<1x16x16xf32> to vector<8x16x16xf32>
    %68 = arith.addf %60, %67 : vector<8x16x16xf32>
    %cst_23 = arith.constant dense<0xFF800000> : vector<8x16xf32>
    %69 = vector.multi_reduction <maximumf>, %68, %cst_23 [2] : vector<8x16x16xf32> to vector<8x16xf32>
    %70 = vector.shape_cast %69 : vector<8x16xf32> to vector<8x16x1xf32>
    %71 = vector.broadcast %70 : vector<8x16x1xf32> to vector<8x16x16xf32>
    %72 = arith.subf %68, %71 : vector<8x16x16xf32>
    %73 = math.exp %72 : vector<8x16x16xf32>
    %cst_24 = arith.constant dense<0.000000e+00> : vector<8x16xf32>
    %74 = vector.multi_reduction <add>, %73, %cst_24 [2] : vector<8x16x16xf32> to vector<8x16xf32>
    %75 = vector.shape_cast %74 : vector<8x16xf32> to vector<8x16x1xf32>
    %76 = tpu.reciprocal %75 {approx = true} : vector<8x16x1xf32> -> vector<8x16x1xf32>
    %77 = vector.broadcast %76 : vector<8x16x1xf32> to vector<8x16x16xf32>
    %78 = arith.mulf %73, %77 : vector<8x16x16xf32>
    %79 = arith.truncf %78 : vector<8x16x16xf32> to vector<8x16x16xbf16>
    %80 = arith.truncf %55 : vector<8x16x8xf32> to vector<8x16x8xbf16>
    %cst_25 = arith.constant dense<0.000000e+00> : vector<8x16x8xf32>
    %81 = tpu.matmul %79, %80, %cst_25 {dimension_numbers = #tpu.dot_dimension_numbers<[2], [1], [1], [2], [0, 0, 0, 1, 1, 2], [0], [0]>} : vector<8x16x16xbf16>, vector<8x16x8xbf16>, vector<8x16x8xf32> -> vector<8x16x8xf32>
    %82 = vector.extract_strided_slice %81 {offsets = [0, 0, 0], sizes = [2, 16, 8], strides = [1, 1, 1]} : vector<8x16x8xf32> to vector<2x16x8xf32>
    %83 = vector.extract_strided_slice %81 {offsets = [2, 0, 0], sizes = [2, 16, 8], strides = [1, 1, 1]} : vector<8x16x8xf32> to vector<2x16x8xf32>
    %84 = vector.extract_strided_slice %81 {offsets = [4, 0, 0], sizes = [2, 16, 8], strides = [1, 1, 1]} : vector<8x16x8xf32> to vector<2x16x8xf32>
    %85 = vector.extract_strided_slice %81 {offsets = [6, 0, 0], sizes = [2, 16, 8], strides = [1, 1, 1]} : vector<8x16x8xf32> to vector<2x16x8xf32>
    %86 = tpu.concatenate %82, %83, %84, %85 in 2 : vector<2x16x8xf32>, vector<2x16x8xf32>, vector<2x16x8xf32>, vector<2x16x8xf32> -> vector<2x16x32xf32>
    %87 = vector.shape_cast %86 : vector<2x16x32xf32> to vector<32x32xf32>
    %88 = arith.truncf %87 : vector<32x32xf32> to vector<32x32xbf16>
    %c0_26 = arith.constant 0 : index
    %c0_27 = arith.constant 0 : index
    %c0_28 = arith.constant 0 : index
    %89 = vector.load %arg6[%c0_26, %c0_27, %c0_28] : memref<1x32x32xbf16, #tpu.memory_space<vmem>>, vector<1x32x32xbf16>
    %90 = vector.shape_cast %89 : vector<1x32x32xbf16> to vector<32x32xbf16>
    %cst_29 = arith.constant dense<0.000000e+00> : vector<32x32xf32>
    %91 = tpu.matmul %88, %90, %cst_29 {dimension_numbers = #tpu.dot_dimension_numbers<[1], [0], [0], [1], [0, 0, 1, 1], [], []>} : vector<32x32xbf16>, vector<32x32xbf16>, vector<32x32xf32> -> vector<32x32xf32>
    %c0_30 = arith.constant 0 : index
    %c0_31 = arith.constant 0 : index
    %c0_32 = arith.constant 0 : index
    %92 = vector.load %arg7[%c0_30, %c0_31, %c0_32] : memref<1x1x32xf32, #tpu.memory_space<vmem>>, vector<1x1x32xf32>
    %93 = vector.shape_cast %92 : vector<1x1x32xf32> to vector<1x32xf32>
    %94 = vector.broadcast %93 : vector<1x32xf32> to vector<32x32xf32>
    %95 = arith.addf %91, %94 : vector<32x32xf32>
    %96 = arith.addf %3, %95 : vector<32x32xf32>
    %c0_33 = arith.constant 0 : index
    %c0_34 = arith.constant 0 : index
    %c0_35 = arith.constant 0 : index
    %97 = vector.load %arg8[%c0_33, %c0_34, %c0_35] : memref<1x1x32xf32, #tpu.memory_space<vmem>>, vector<1x1x32xf32>
    %98 = vector.shape_cast %97 : vector<1x1x32xf32> to vector<1x32xf32>
    %c0_36 = arith.constant 0 : index
    %c0_37 = arith.constant 0 : index
    %c0_38 = arith.constant 0 : index
    %99 = vector.load %arg9[%c0_36, %c0_37, %c0_38] : memref<1x1x32xf32, #tpu.memory_space<vmem>>, vector<1x1x32xf32>
    %100 = vector.shape_cast %99 : vector<1x1x32xf32> to vector<1x32xf32>
    %cst_39 = arith.constant dense<0.000000e+00> : vector<32xf32>
    %101 = vector.multi_reduction <add>, %96, %cst_39 [1] : vector<32x32xf32> to vector<32xf32>
    %102 = vector.shape_cast %101 : vector<32xf32> to vector<32x1xf32>
    %cst_40 = arith.constant 3.200000e+01 : f32
    %103 = vector.broadcast %cst_40 : f32 to vector<32x1xf32>
    %104 = arith.divf %102, %103 : vector<32x1xf32>
    %105 = vector.broadcast %104 : vector<32x1xf32> to vector<32x32xf32>
    %106 = arith.subf %96, %105 : vector<32x32xf32>
    %107 = vector.broadcast %104 : vector<32x1xf32> to vector<32x32xf32>
    %108 = arith.subf %96, %107 : vector<32x32xf32>
    %109 = arith.mulf %106, %108 : vector<32x32xf32>
    %cst_41 = arith.constant dense<0.000000e+00> : vector<32xf32>
    %110 = vector.multi_reduction <add>, %109, %cst_41 [1] : vector<32x32xf32> to vector<32xf32>
    %111 = vector.shape_cast %110 : vector<32xf32> to vector<32x1xf32>
    %cst_42 = arith.constant 3.200000e+01 : f32
    %112 = vector.broadcast %cst_42 : f32 to vector<32x1xf32>
    %113 = arith.divf %111, %112 : vector<32x1xf32>
    %114 = vector.broadcast %104 : vector<32x1xf32> to vector<32x32xf32>
    %115 = arith.subf %96, %114 : vector<32x32xf32>
    %cst_43 = arith.constant 9.99999974E-6 : f32
    %116 = vector.broadcast %cst_43 : f32 to vector<32x1xf32>
    %117 = arith.addf %113, %116 : vector<32x1xf32>
    %118 = math.rsqrt %117 : vector<32x1xf32>
    %119 = vector.broadcast %118 : vector<32x1xf32> to vector<32x32xf32>
    %120 = arith.mulf %115, %119 : vector<32x32xf32>
    %121 = vector.broadcast %98 : vector<1x32xf32> to vector<32x32xf32>
    %122 = arith.mulf %120, %121 : vector<32x32xf32>
    %123 = vector.broadcast %100 : vector<1x32xf32> to vector<32x32xf32>
    %124 = arith.addf %122, %123 : vector<32x32xf32>
    %125 = arith.truncf %124 : vector<32x32xf32> to vector<32x32xbf16>
    %c0_44 = arith.constant 0 : index
    %c0_45 = arith.constant 0 : index
    %c0_46 = arith.constant 0 : index
    %126 = vector.load %arg10[%c0_44, %c0_45, %c0_46] : memref<1x32x128xbf16, #tpu.memory_space<vmem>>, vector<1x32x128xbf16>
    %127 = vector.shape_cast %126 : vector<1x32x128xbf16> to vector<32x128xbf16>
    %cst_47 = arith.constant dense<0.000000e+00> : vector<32x128xf32>
    %128 = tpu.matmul %125, %127, %cst_47 {dimension_numbers = #tpu.dot_dimension_numbers<[1], [0], [0], [1], [0, 0, 1, 1], [], []>} : vector<32x32xbf16>, vector<32x128xbf16>, vector<32x128xf32> -> vector<32x128xf32>
    %c0_48 = arith.constant 0 : index
    %c0_49 = arith.constant 0 : index
    %c0_50 = arith.constant 0 : index
    %129 = vector.load %arg11[%c0_48, %c0_49, %c0_50] : memref<1x1x128xf32, #tpu.memory_space<vmem>>, vector<1x1x128xf32>
    %130 = vector.shape_cast %129 : vector<1x1x128xf32> to vector<1x128xf32>
    %131 = vector.broadcast %130 : vector<1x128xf32> to vector<32x128xf32>
    %132 = arith.addf %128, %131 : vector<32x128xf32>
    %cst_51 = arith.constant 5.000000e-01 : f32
    %133 = vector.broadcast %cst_51 : f32 to vector<32x128xf32>
    %134 = arith.mulf %133, %132 : vector<32x128xf32>
    %cst_52 = arith.constant 4.471500e-02 : f32
    %135 = vector.broadcast %cst_52 : f32 to vector<32x128xf32>
    %136 = arith.mulf %135, %132 : vector<32x128xf32>
    %137 = arith.mulf %136, %132 : vector<32x128xf32>
    %138 = arith.mulf %137, %132 : vector<32x128xf32>
    %139 = arith.addf %132, %138 : vector<32x128xf32>
    %cst_53 = arith.constant 0.797884583 : f32
    %140 = vector.broadcast %cst_53 : f32 to vector<32x128xf32>
    %141 = arith.mulf %140, %139 : vector<32x128xf32>
    %142 = math.tanh %141 : vector<32x128xf32>
    %cst_54 = arith.constant 1.000000e+00 : f32
    %143 = vector.broadcast %cst_54 : f32 to vector<32x128xf32>
    %144 = arith.addf %143, %142 : vector<32x128xf32>
    %145 = arith.mulf %134, %144 : vector<32x128xf32>
    %146 = arith.truncf %145 : vector<32x128xf32> to vector<32x128xbf16>
    %c0_55 = arith.constant 0 : index
    %c0_56 = arith.constant 0 : index
    %c0_57 = arith.constant 0 : index
    %147 = vector.load %arg12[%c0_55, %c0_56, %c0_57] : memref<1x128x32xbf16, #tpu.memory_space<vmem>>, vector<1x128x32xbf16>
    %148 = vector.shape_cast %147 : vector<1x128x32xbf16> to vector<128x32xbf16>
    %cst_58 = arith.constant dense<0.000000e+00> : vector<32x32xf32>
    %149 = tpu.matmul %146, %148, %cst_58 {dimension_numbers = #tpu.dot_dimension_numbers<[1], [0], [0], [1], [0, 0, 1, 1], [], []>} : vector<32x128xbf16>, vector<128x32xbf16>, vector<32x32xf32> -> vector<32x32xf32>
    %c0_59 = arith.constant 0 : index
    %c0_60 = arith.constant 0 : index
    %c0_61 = arith.constant 0 : index
    %150 = vector.load %arg13[%c0_59, %c0_60, %c0_61] : memref<1x1x32xf32, #tpu.memory_space<vmem>>, vector<1x1x32xf32>
    %151 = vector.shape_cast %150 : vector<1x1x32xf32> to vector<1x32xf32>
    %152 = vector.broadcast %151 : vector<1x32xf32> to vector<32x32xf32>
    %153 = arith.addf %149, %152 : vector<32x32xf32>
    %154 = arith.addf %96, %153 : vector<32x32xf32>
    %c0_62 = arith.constant 0 : index
    %c0_63 = arith.constant 0 : index
    %155 = vector.load %arg14[%c0_62, %c0_63] : memref<32x32xf32, #tpu.memory_space<vmem>>, vector<32x32xf32>
    tpu.vector_store %arg14[%c0_62, %c0_63], %154 {strides = array<i32>} : memref<32x32xf32, #tpu.memory_space<vmem>>, vector<32x32xf32>,
    return
  }
  func.func @transform_0(%arg0: i32) -> (i32, i32) {
    %c0_i32 = arith.constant 0 : i32
    %c0_i32_0 = arith.constant 0 : i32
    %c0_i32_1 = arith.constant 0 : i32
    return %c0_i32, %c0_i32_0 : i32, i32
  }
  func.func @transform_1(%arg0: i32) -> (i32, i32, i32) {
    %c0_i32 = arith.constant 0 : i32
    %c0_i32_0 = arith.constant 0 : i32
    %c0_i32_1 = arith.constant 0 : i32
    return %arg0, %c0_i32, %c0_i32_0 : i32, i32, i32
  }
  func.func @transform_2(%arg0: i32) -> (i32, i32, i32) {
    %c0_i32 = arith.constant 0 : i32
    %c0_i32_0 = arith.constant 0 : i32
    %c0_i32_1 = arith.constant 0 : i32
    return %arg0, %c0_i32, %c0_i32_0 : i32, i32, i32
  }
  func.func @transform_3(%arg0: i32) -> (i32, i32, i32) {
    %c0_i32 = arith.constant 0 : i32
    %c0_i32_0 = arith.constant 0 : i32
    %c0_i32_1 = arith.constant 0 : i32
    return %arg0, %c0_i32, %c0_i32_0 : i32, i32, i32
  }
  func.func @transform_4(%arg0: i32) -> (i32, i32, i32) {
    %c0_i32 = arith.constant 0 : i32
    %c0_i32_0 = arith.constant 0 : i32
    %c0_i32_1 = arith.constant 0 : i32
    return %arg0, %c0_i32, %c0_i32_0 : i32, i32, i32
  }
  func.func @transform_5(%arg0: i32) -> (i32, i32, i32) {
    %c0_i32 = arith.constant 0 : i32
    %c0_i32_0 = arith.constant 0 : i32
    %c0_i32_1 = arith.constant 0 : i32
    return %arg0, %c0_i32, %c0_i32_0 : i32, i32, i32
  }
  func.func @transform_6(%arg0: i32) -> (i32, i32, i32) {
    %c0_i32 = arith.constant 0 : i32
    %c0_i32_0 = arith.constant 0 : i32
    %c0_i32_1 = arith.constant 0 : i32
    return %arg0, %c0_i32, %c0_i32_0 : i32, i32, i32
  }
  func.func @transform_7(%arg0: i32) -> (i32, i32, i32) {
    %c0_i32 = arith.constant 0 : i32
    %c0_i32_0 = arith.constant 0 : i32
    %c0_i32_1 = arith.constant 0 : i32
    return %arg0, %c0_i32, %c0_i32_0 : i32, i32, i32
  }
  func.func @transform_8(%arg0: i32) -> (i32, i32, i32) {
    %c0_i32 = arith.constant 0 : i32
    %c0_i32_0 = arith.constant 0 : i32
    %c0_i32_1 = arith.constant 0 : i32
    return %arg0, %c0_i32, %c0_i32_0 : i32, i32, i32
  }
  func.func @transform_9(%arg0: i32) -> (i32, i32, i32) {
    %c0_i32 = arith.constant 0 : i32
    %c0_i32_0 = arith.constant 0 : i32
    %c0_i32_1 = arith.constant 0 : i32
    return %arg0, %c0_i32, %c0_i32_0 : i32, i32, i32
  }
  func.func @transform_10(%arg0: i32) -> (i32, i32, i32) {
    %c0_i32 = arith.constant 0 : i32
    %c0_i32_0 = arith.constant 0 : i32
    %c0_i32_1 = arith.constant 0 : i32
    return %arg0, %c0_i32, %c0_i32_0 : i32, i32, i32
  }
  func.func @transform_11(%arg0: i32) -> (i32, i32, i32) {
    %c0_i32 = arith.constant 0 : i32
    %c0_i32_0 = arith.constant 0 : i32
    %c0_i32_1 = arith.constant 0 : i32
    return %arg0, %c0_i32, %c0_i32_0 : i32, i32, i32
  }
  func.func @transform_12(%arg0: i32) -> (i32, i32, i32) {
    %c0_i32 = arith.constant 0 : i32
    %c0_i32_0 = arith.constant 0 : i32
    %c0_i32_1 = arith.constant 0 : i32
    return %arg0, %c0_i32, %c0_i32_0 : i32, i32, i32
  }
  func.func @transform_13(%arg0: i32) -> (i32, i32) {
    %c0_i32 = arith.constant 0 : i32
    %c0_i32_0 = arith.constant 0 : i32
    %c0_i32_1 = arith.constant 0 : i32
    return %c0_i32, %c0_i32_0 : i32, i32
  }
}

</mosaic_0001>

<bundles_post_ra>
// kernel: gpt_forward.3
= control target key start
LH: loop header
LB: loop body
LE: loop exit
PB: predicated region body
PF: predicated region fallthrough
CT: control target
= control target key end

     0   :  { %vm21_vm0 = vcmask 261120   ;;  %v137_v8 = vmov 0.0   ;;  %vm138_vm1 = vmmov 0   ;;  %s185_s0 = inlined_call_operand.vmem [shape: f32[8,32], index: 0, kind: input, shape index: {}]   ;;  %s186_s3 = inlined_call_operand.vmem [shape: bf16[32,128], index: 3, kind: input, shape index: {}]   ;;  %s187_s1 = inlined_call_operand.vmem [shape: f32[1,32], index: 1, kind: input, shape index: {}]   ;;  %s188_s2 = inlined_call_operand.vmem [shape: f32[1,32], index: 2, kind: input, shape index: {}]   ;;  %s189_s4 = inlined_call_operand.vmem [shape: f32[8,128], index: 4, kind: output, shape index: {}]  }
   0x1   :  { %v18_v0 = vld [vmem:[%s185_s0] sm:$0xff]  ;;  %123 = vmatprep.subr.bf16.mxu0 %v137_v8  ;;  %v134_v9 = vld [vmem:[%s186_s3 + $0x8] sm:$0xff]   ;;  %127 = vmatprep.mubr.msk.bf16.mxu0 %vm138_vm1, %v137_v8 }
   0x2   :  { %v22_v1 = vsel %vm21_vm0, %v18_v0, 0.0  ;;  %v133_v7 = vld [vmem:[%s186_s3] sm:$0xff]  }
   0x3   :  { %23 = vadd.xlane.f32.xlu0 %v22_v1  ;;  %124 = vmatpush3.bf16.msra.mxu0 %v133_v7  ;;  %v115_v14 = vld [vmem:[%s187_s1] ss:$0 sm:$0xff] }
   0x4   :  { %125 = vmatprep.subr.bf16.mxu0 %v137_v8  ;;  %v116_v16 = vld [vmem:[%s188_s2] ss:$0 sm:$0xff] }
   0x7   :  { %126 = vmatpush3.bf16.msra.mxu0 %v134_v9 }
  0x90   :  { %v24_v2 = vpop.xlane.xlu0 %23 }
  0x91   :  { %v26_v3 = vmul.f32 0.03125, %v24_v2 }
  0x93   :  { %v27_v4 = vsub.f32 %v18_v0, %v26_v3 }
  0x95   :  { %v28_v5 = vmul.f32 %v27_v4, %v27_v4 }
  0x97   :  { %v29_v6 = vsel %vm21_vm0, %v28_v5, 0.0 }
  0x98   :  { %30 = vadd.xlane.f32.xlu0 %v29_v6 }
 0x125   :  { %v31_v10 = vpop.xlane.xlu0 %30 }
 0x126   :  { %v32_v11 = vmul.f32 0.03125, %v31_v10 }
 0x128   :  { %v33_v12 = vadd.f32 1e-05, %v32_v11 }
 0x12a   :  { %135 = vrsqrt.f32 %v33_v12 }
 0x134   :  { %v136_v13 = vpop.eup %135 }
 0x135   :  { %v35_v15 = vmul.f32 %v136_v13, %v27_v4 }
 0x137   :  { %v42_v17 = vmul.f32 %v115_v14, %v35_v15 }
 0x139   :  { %v49_v18 = vadd.f32 %v116_v16, %v42_v17 }
 0x13b   :  { %v50_v19 = vpack.c.bf16 %v49_v18, %v49_v18 }
 0x13d   :  { %128 = vmatmul.mubr.msk.bf16.vlgmr.msra.gmra.mrb[0].mxu0 %vm21_vm0, %v50_v19 }
 0x210   :  { %v104_v20 = vpop.f32.mrb[0].mxu0 }
 0x211   :  { %110 = vst [vmem:[%s189_s4] sm:$0xff] %v104_v20  ;;  %v129_v21 = vpop.f32.mrb[1].mxu0 }
 0x212   :  { %v107_v22 = vpop.f32.mrb[2].mxu0 }
 0x213   :  { %v130_v23 = vpop.f32.mrb[3].mxu0 }

// kernel: gpt_forward.2
= control target key start
LH: loop header
LB: loop body
LE: loop exit
PB: predicated region body
PF: predicated region fallthrough
CT: control target
= control target key end

     0   :  { %s2955_s25 = smov 0   ;;  %s3511_s0 = inlined_call_operand.vmem [shape: f32[32,32], index: 0, kind: input, shape index: {}]   ;;  %s3512_s1 = inlined_call_operand.vmem [shape: f32[2,1,32], index: 1, kind: input, shape index: {}]   ;;  %s3513_s2 = inlined_call_operand.vmem [shape: f32[2,1,32], index: 2, kind: input, shape index: {}]   ;;  %s3514_s3 = inlined_call_operand.vmem [shape: bf16[2,32,96], index: 3, kind: input, shape index: {}]   ;;  %s3515_s4 = inlined_call_operand.vmem [shape: f32[2,1,96], index: 4, kind: input, shape index: {}]   ;;  %s3516_s5 = inlined_call_operand.vmem [shape: bf16[2,32,32], index: 5, kind: input, shape index: {}]   ;;  %s3517_s6 = inlined_call_operand.vmem [shape: f32[2,1,32], index: 6, kind: input, shape index: {}]   ;;  %s3518_s7 = inlined_call_operand.vmem [shape: f32[2,1,32], index: 7, kind: input, shape index: {}]   ;;  %s3519_s8 = inlined_call_operand.vmem [shape: f32[2,1,32], index: 8, kind: input, shape index: {}]   ;;  %s3520_s9 = inlined_call_operand.vmem [shape: bf16[2,32,128], index: 9, kind: input, shape index: {}]   ;;  %s3521_s10 = inlined_call_operand.vmem [shape: f32[2,1,128], index: 10, kind: input, shape index: {}]   ;;  %s3522_s11 = inlined_call_operand.vmem [shape: bf16[2,128,32], index: 11, kind: input, shape index: {}]   ;;  %s3523_s12 = inlined_call_operand.vmem [shape: f32[2,1,32], index: 12, kind: input, shape index: {}]   ;;  %s3524_s13 = inlined_call_operand.vmem [shape: f32[32,32], index: 13, kind: output, shape index: {}]  }
   0x1   :  { %3527 = sst [smem:[#allocation4_spill]] %s3513_s2 }
   0x2   :  { %3528 = sst [smem:[#allocation5_spill]] %s3514_s3 }
   0x3   :  { %3529 = sst [smem:[#allocation6_spill]] %s3516_s5 }
   0x4 LB: > { %3530 = sst [smem:[#allocation2_spill]] %s2872_s25  ;;  %s2424_s26 = sadd.s32 4294967295, %s2872_s25   ;;  %s2872_s25 = sphi %s2955_s25, %s23_s25  }
   0x5   : > { %p2427_p0 = scmp.ge.s32.totalorder %s2872_s25, 1  ;;  %p476_p1 = scmp.lt.s32.totalorder %s2872_s25, 3 }
   0x7   : > { %p477_p2 = pnand %p2427_p0, %p476_p1 }
   0x9   : > { %480 = sbr.rel (%p477_p2) target bundleno = 2764 (0xacc), region = 72 }
  0x10   : > { %p554_p3 = scmp.lt.s32.totalorder %s2424_s26, 1  ;;  %s3532_s3 = sld [smem:[#allocation5_spill]] }
  0x11   : > { %s3533_s5 = sld [smem:[#allocation6_spill]]  ;;  %p2436_p4 = scmp.ne.s32.totalorder %s2424_s26, 0 }
  0x12   : > { %s2963_s27 = scalar_select %p554_p3, %s2424_s26, 1 }
  0x13   : > { %602 = sbr.rel (%p2436_p4) target bundleno = 26 (0x1a), region = 76  ;;  %v603_v0 = vld [vmem:[%s3511_s0] sm:$0xff] (!%p2436_p4)  ;;  %vm607_vm0 = vcmask (!%p2436_p4), 261120   ;;  %v604_v1 = vld [vmem:[%s3511_s0 + $0x8] sm:$0xff] (!%p2436_p4)  ;;  %v605_v2 = vld [vmem:[%s3511_s0 + $0x10] sm:$0xff] (!%p2436_p4) }
  0x14   : > { %s2483_s17 = sshll.u32 %s2963_s27, 4  ;;  %s578_s2 = scalar_lea.vmem %s3518_s7, %s2963_s27  ;;  %608 = vst.msk [vmem:[%s3524_s13] sm:$0xff] (!%p2436_p4), %vm607_vm0, %v603_v0  ;;  %609 = vst.msk [vmem:[%s3524_s13 + $0x8] sm:$0xff] (!%p2436_p4), %vm607_vm0, %v604_v1  ;;  %v606_v3 = vld [vmem:[%s3511_s0 + $0x18] sm:$0xff] (!%p2436_p4) }
  0x15   : > { %s581_s20 = scalar_lea.vmem %s3519_s8, %s2963_s27  ;;  %s597_s18 = scalar_lea.vmem %s3523_s12, %s2963_s27  ;;  %610 = vst.msk [vmem:[%s3524_s13 + $0x10] sm:$0xff] (!%p2436_p4), %vm607_vm0, %v605_v2  ;;  %611 = vst.msk [vmem:[%s3524_s13 + $0x18] sm:$0xff] (!%p2436_p4), %vm607_vm0, %v606_v3 }
  0x16   : > { %s2981_s23 = scalar_lea.vmem %s3532_s3, %s2483_s17  ;;  %s3003_s3 = scalar_lea.vmem %s3520_s9, %s2483_s17 }
  0x17   : > { %s2986_s29 = scalar_lea.vmem %s3533_s5, %s2483_s17  ;;  %s589_s5 = scalar_lea.vmem %s3521_s10, %s2963_s27 }
  0x18   : > { %3534 = sst [smem:[#allocation3_spill]] %s2986_s29  ;;  %s2486_s29 = sshll.u32 %s2963_s27, 6 }
  0x19   : > { %s3013_s14 = scalar_lea.vmem %s3522_s11, %s2486_s29 }
  0x1a PF: > { %vm618_vm1 = vcmask 261120   ;;  %v2760_v32 = vld [vmem:[%s2981_s23] sm:$0xff]   ;;  %v2761_v33 = vld [vmem:[%s2981_s23 + $0x8] sm:$0xff]   ;;  %s3535_s21 = scalar_lea.vmem %s3512_s1, %s2963_s27  ;;  %s3536_s24 = sld [smem:[#allocation4_spill]]  ;;  %vm2877_vm2 = vmmov 0   ;;  %vm823_vm3 = vcmask 64512  }
  0x1b   : > { %v612_v4 = vld [vmem:[%s3524_s13] sm:$0xff]  ;;  %v613_v6 = vld [vmem:[%s3524_s13 + $0x8] sm:$0xff]  ;;  %2541 = vmatprep.subr.bf16.mxu0 %v2760_v32  ;;  %s3538_s30 = scalar_lea.vmem %s3515_s4, %s2963_s27  ;;  %s2875_s26 = smov 120   ;;  %vm1262_vm6 = vcmask 130048   ;;  %vm1879_vm7 = vcmask 195584  }
  0x1c   : > { %v614_v5 = vld [vmem:[%s3524_s13 + $0x10] sm:$0xff]  ;;  %v619_v7 = vsel %vm618_vm1, %v612_v4, 0.0  ;;  %v615_v9 = vld [vmem:[%s3524_s13 + $0x18] sm:$0xff]  ;;  %v622_v10 = vsel %vm618_vm1, %v613_v6, 0.0  ;;  %2542 = vmatpush3.bf16.msra.mxu0 %v2760_v32  ;;  %v2437_v48 = vld [vmem:[%s3535_s21] ss:$0 sm:$0xff]  ;;  %s3540_s25 = scalar_lea.vmem %s3517_s6, %s2963_s27 }
  0x1d   : > { %v625_v8 = vsel %vm618_vm1, %v614_v5, 0.0  ;;  %620 = vadd.xlane.f32.xlu0 %v619_v7  ;;  %v628_v11 = vsel %vm618_vm1, %v615_v9, 0.0  ;;  %2543 = vmatprep.subr.bf16.mxu0 %v2761_v33  ;;  %v2439_v3 = vld [vmem:[%s3538_s30] ss:$0 sm:$0xff]  ;;  %s2876_s16 = smov 112   ;;  %s2878_s15 = smov 104  }
  0x1e   : > { %626 = vadd.xlane.f32.xlu1 %v625_v8  ;;  %s2879_s23 = smov 96   ;;  %s2881_s19 = smov 64  }
  0x1f   : > { %s2882_s21 = smov 8   ;;  %s3539_s17 = sld [smem:[#allocation3_spill]] }
  0x20   : > { %2544 = vmatpush3.bf16.msra.mxu0 %v2761_v33  ;;  %s3537_s28 = scalar_lea.vmem %s3536_s24, %s2963_s27  ;;  %s2883_s22 = smov 16  }
  0x21   : > { %623 = vadd.xlane.f32.xlu0 %v622_v10  ;;  %v2438_v54 = vld [vmem:[%s3537_s28] ss:$0 sm:$0xff]  ;;  %s2884_s24 = smov 24  }
  0x22   : > { %629 = vadd.xlane.f32.xlu1 %v628_v11  ;;  %v2874_v11 = vmov 0.0  }
  0x23   : > { %2549 = vmatprep.subr.bf16.mxu0 %v2874_v11  ;;  %2561 = vmatprep.subr.bf16.mxu1 %v2874_v11 }
  0x24   : > { %2563 = vmatprep.mubr.msk.bf16.mxu1 %vm2877_vm2, %v2874_v11 }
  0xaa   : > { %v621_v12 = vpop.xlane.xlu0 %620 }
  0xab   : > { %v627_v13 = vpop.xlane.xlu1 %626  ;;  %v632_v14 = vmul.f32 0.03125, %v621_v12 }
  0xac   : > { %v634_v15 = vmul.f32 0.03125, %v627_v13 }
  0xad   : > { %v636_v16 = vsub.f32 %v612_v4, %v632_v14 }
  0xae   : > { %v638_v17 = vsub.f32 %v614_v5, %v634_v15  ;;  %v624_v18 = vpop.xlane.xlu0 %623 }
  0xaf   : > { %v630_v19 = vpop.xlane.xlu1 %629  ;;  %v633_v20 = vmul.f32 0.03125, %v624_v18  ;;  %v640_v22 = vmul.f32 %v636_v16, %v636_v16 }
  0xb0   : > { %v635_v21 = vmul.f32 0.03125, %v630_v19  ;;  %v642_v23 = vmul.f32 %v638_v17, %v638_v17 }
  0xb1   : > { %v637_v24 = vsub.f32 %v613_v6, %v633_v20  ;;  %v644_v26 = vsel %vm618_vm1, %v640_v22, 0.0 }
  0xb2   : > { %v639_v25 = vsub.f32 %v615_v9, %v635_v21  ;;  %645 = vadd.xlane.f32.xlu0 %v644_v26  ;;  %v650_v27 = vsel %vm618_vm1, %v642_v23, 0.0 }
  0xb3   : > { %v641_v28 = vmul.f32 %v637_v24, %v637_v24 }
  0xb4   : > { %v643_v29 = vmul.f32 %v639_v25, %v639_v25 }
  0xb5   : > { %v647_v30 = vsel %vm618_vm1, %v641_v28, 0.0 }
  0xb6   : > { %651 = vadd.xlane.f32.xlu0 %v650_v27  ;;  %648 = vadd.xlane.f32.xlu1 %v647_v30  ;;  %v653_v31 = vsel %vm618_vm1, %v643_v29, 0.0 }
  0xba   : > { %654 = vadd.xlane.f32.xlu1 %v653_v31 }
 0x13f   : > { %v646_v34 = vpop.xlane.xlu0 %645 }
 0x140   : > { %v656_v35 = vmul.f32 0.03125, %v646_v34 }
 0x142   : > { %v660_v36 = vadd.f32 1e-05, %v656_v35 }
 0x143   : > { %v649_v37 = vpop.xlane.xlu1 %648  ;;  %v652_v38 = vpop.xlane.xlu0 %651 }
 0x144   : > { %2774 = vrsqrt.f32 %v660_v36  ;;  %v657_v39 = vmul.f32 0.03125, %v649_v37  ;;  %v658_v40 = vmul.f32 0.03125, %v652_v38 }
 0x146   : > { %v661_v41 = vadd.f32 1e-05, %v657_v39  ;;  %v662_v42 = vadd.f32 1e-05, %v658_v40 }
 0x147   : > { %v655_v43 = vpop.xlane.xlu1 %654 }
 0x148   : > { %2776 = vrsqrt.f32 %v661_v41  ;;  %v659_v44 = vmul.f32 0.03125, %v655_v43 }
 0x149   : > { %2778 = vrsqrt.f32 %v662_v42 }
 0x14a   : > { %v663_v45 = vadd.f32 1e-05, %v659_v44 }
 0x14c   : > { %2780 = vrsqrt.f32 %v663_v45 }
 0x14e   : > { %v2775_v46 = vpop.eup %2774 }
 0x14f   : > { %v668_v47 = vmul.f32 %v2775_v46, %v636_v16 }
 0x151   : > { %v678_v52 = vmul.f32 %v2437_v48, %v668_v47 }
 0x152   : > { %v2777_v49 = vpop.eup %2776 }
 0x153   : > { %v2779_v50 = vpop.eup %2778  ;;  %v669_v51 = vmul.f32 %v2777_v49, %v637_v24  ;;  %v688_v58 = vadd.f32 %v2438_v54, %v678_v52 }
 0x154   : > { %v670_v53 = vmul.f32 %v2779_v50, %v638_v17 }
 0x155   : > { %v679_v55 = vmul.f32 %v2437_v48, %v669_v51 }
 0x156   : > { %v2781_v56 = vpop.eup %2780  ;;  %v680_v60 = vmul.f32 %v2437_v48, %v670_v53 }
 0x157   : > { %v671_v57 = vmul.f32 %v2781_v56, %v639_v25  ;;  %v689_v59 = vadd.f32 %v2438_v54, %v679_v55  ;;  %v1237_v56 = vlaneseq }
 0x158   : > { %v690_v63 = vadd.f32 %v2438_v54, %v680_v60 }
 0x159   : > { %v692_v61 = vpack.c.bf16 %v689_v59, %v688_v58  ;;  %v681_v62 = vmul.f32 %v2437_v48, %v671_v57  ;;  %v1238_v57 = vshrl.u32 %v1237_v56, 7  ;;  %v1241_v58 = vand.u32 127, %v1237_v56 }
 0x15b   : > { %2545 = vmatprep.mubr.msk.bf16.mxu0 %vm618_vm1, %v692_v61  ;;  %v691_v0 = vadd.f32 %v2438_v54, %v681_v62  ;;  %v1239_v59 = vadd.s32 8, %v1238_v57  ;;  %vm1242_vm4 = vcmp.ge.s32.totalorder %v1238_v57, %v1241_v58  ;;  %v2880_v61 = vmov -1e+30  }
 0x15c   : > { %v3168_v62 = vsel %vm1242_vm4, 0.0, %v2880_v61 }
 0x15d   : > { %v693_v1 = vpack.c.bf16 %v691_v0, %v690_v63  ;;  %vm1243_vm5 = vcmp.ge.s32.totalorder %v1239_v59, %v1241_v58 }
 0x15f   : > { %2546 = vmatmul.mubr.msk.bf16.vlgmr.msra.gmra.mrb[0].mxu0 %vm618_vm1, %v693_v1 }
 0x160   : > { %2551 = vmatprep.mubr.msk.bf16.mxu0 %vm2877_vm2, %v2874_v11 }
 0x232   : > { %v2547_v2 = vpop.f32.mrb[0].mxu0 }
 0x233   : > { %v757_v4 = vpop.f32.mrb[1].mxu0  ;;  %v766_v6 = vadd.f32 %v2547_v2, %v2439_v3  ;;  %v3170_v2 = vsel %vm1243_vm5, 0.0, %v2880_v61 }
 0x234   : > { %v2548_v5 = vpop.f32.mrb[2].mxu0  ;;  %v758_v9 = vadd.f32 %v2439_v3, %v757_v4 }
 0x235   : > { %v769_v7 = vadd.f32 %v2548_v5, %v2439_v3  ;;  %v760_v8 = vpop.f32.mrb[3].mxu0 }
 0x236   : > { %v761_v10 = vadd.f32 %v2439_v3, %v760_v8 }
 0x237   : > { %v2705_v12 = vpack.i.bf16 %v769_v7, %v766_v6  ;;  %v3084_v13 = vpack.c.bf16 %v769_v7, %v766_v6 }
 0x238   : > { %v2700_v14 = vpack.i.bf16 %v761_v10, %v758_v9  ;;  %v3086_v15 = vpack.c.bf16 %v761_v10, %v758_v9 }
 0x239   : > { %2706 = vrot.lane.b32.xlu1 %v2705_v12, %s2875_s26 }
 0x23a   : > { %2701 = vrot.lane.b32.xlu0 %v2700_v14, %s2875_s26 }
 0x23d   : > { %2711 = vrot.lane.b32.xlu1 %v2700_v14, %s2876_s16 }
 0x23e   : > { %2721 = vrot.lane.b32.xlu0 %v2700_v14, %s2878_s15 }
 0x241   : > { %2716 = vrot.lane.b32.xlu1 %v2705_v12, %s2876_s16 }
 0x242   : > { %821 = vrot.lane.b32.xlu0 %v3086_v15, %s2879_s23 }
 0x245   : > { %2726 = vrot.lane.b32.xlu1 %v2705_v12, %s2878_s15 }
 0x249   : > { %872 = vrot.lane.b32.xlu1 %v3084_v13, %s2879_s23 }
 0x2ab   : > { %v2707_v16 = vpop.permute.xlu1 %2706 }
 0x2ac   : > { %v2709_v17 = vunpack.i.h.bf16 %v2707_v16  ;;  %v2708_v18 = vunpack.i.l.bf16 %v2707_v16  ;;  %v2702_v19 = vpop.permute.xlu0 %2701 }
 0x2ad   : > { %v2704_v20 = vunpack.i.h.bf16 %v2702_v19  ;;  %v2703_v21 = vunpack.i.l.bf16 %v2702_v19 }
 0x2ae   : > { %v3096_v22 = vpack.c.bf16 %v2709_v17, %v2708_v18 }
 0x2af   : > { %v3098_v23 = vpack.c.bf16 %v2704_v20, %v2703_v21  ;;  %v2712_v24 = vpop.permute.xlu1 %2711 }
 0x2b0   : > { %v2714_v25 = vunpack.i.h.bf16 %v2712_v24  ;;  %v2713_v26 = vunpack.i.l.bf16 %v2712_v24  ;;  %972 = vrot.lane.b32.xlu1 %v3096_v22, %s2879_s23  ;;  %v2722_v27 = vpop.permute.xlu0 %2721 }
 0x2b1   : > { %922 = vrot.lane.b32.xlu0 %v3098_v23, %s2879_s23  ;;  %v2724_v29 = vunpack.i.h.bf16 %v2722_v27  ;;  %v2723_v30 = vunpack.i.l.bf16 %v2722_v27 }
 0x2b2   : > { %v3104_v28 = vpack.c.bf16 %v2714_v25, %v2713_v26 }
 0x2b3   : > { %v2717_v31 = vpop.permute.xlu1 %2716  ;;  %v3111_v37 = vpack.c.bf16 %v2724_v29, %v2723_v30 }
 0x2b4   : > { %v2719_v32 = vunpack.i.h.bf16 %v2717_v31  ;;  %v2718_v33 = vunpack.i.l.bf16 %v2717_v31  ;;  %v822_v34 = vpop.permute.xlu0 %821 }
 0x2b5   : > { %v828_v35 = vsel %vm823_vm3, %v822_v34, 0  ;;  %1022 = vrot.lane.b32.xlu0 %v3104_v28, %s2879_s23 }
 0x2b6   : > { %v3109_v36 = vpack.c.bf16 %v2719_v32, %v2718_v33  ;;  %2550 = vmatpush3.bf16.xpose.msra.mxu0 %v828_v35 }
 0x2b7   : > { %v2727_v38 = vpop.permute.xlu1 %2726  ;;  %2555 = vmatprep.subr.bf16.mxu0 %v2874_v11 }
 0x2b8   : > { %v2729_v39 = vunpack.i.h.bf16 %v2727_v38  ;;  %v2728_v40 = vunpack.i.l.bf16 %v2727_v38  ;;  %1072 = vrot.lane.b32.xlu1 %v3109_v36, %s2879_s23 }
 0x2b9   : > { %1122 = vrot.lane.b32.xlu0 %v3111_v37, %s2879_s23 }
 0x2ba   : > { %v3118_v41 = vpack.c.bf16 %v2729_v39, %v2728_v40 }
 0x2bb   : > { %v873_v42 = vpop.permute.xlu1 %872 }
 0x2bc   : > { %v878_v43 = vsel %vm823_vm3, %v873_v42, 0  ;;  %1172 = vrot.lane.b32.xlu1 %v3118_v41, %s2879_s23 }
 0x2bd   : > { %2552 = vmatmul.mubr.msk.bf16.vlgmr.msra.gmra.mrb[4].mxu0 %vm823_vm3, %v3086_v15 }
 0x2be   : > { %2556 = vmatpush3.bf16.xpose.msra.mxu0 %v878_v43  ;;  %2557 = vmatprep.mubr.msk.bf16.mxu0 %vm2877_vm2, %v2874_v11 }
 0x2bf   : > { %2567 = vmatprep.subr.bf16.mxu0 %v2874_v11 }
 0x2c5   : > { %2558 = vmatmul.mubr.msk.bf16.vlgmr.msra.gmra.mrb[8].mxu0 %vm823_vm3, %v3084_v13 }
 0x2c6   : > { %2569 = vmatprep.mubr.msk.bf16.mxu0 %vm2877_vm2, %v2874_v11 }
 0x322   : > { %v973_v44 = vpop.permute.xlu1 %972 }
 0x323   : > { %v978_v45 = vsel %vm823_vm3, %v973_v44, 0  ;;  %v923_v46 = vpop.permute.xlu0 %922 }
 0x324   : > { %2568 = vmatpush3.bf16.xpose.msra.mxu0 %v978_v45  ;;  %v928_v47 = vsel %vm823_vm3, %v923_v46, 0 }
 0x325   : > { %2562 = vmatpush3.bf16.xpose.msra.mxu1 %v928_v47  ;;  %2579 = vmatprep.subr.bf16.mxu0 %v2874_v11 }
 0x326   : > { %2573 = vmatprep.subr.bf16.mxu1 %v2874_v11 }
 0x327   : > { %v1023_v48 = vpop.permute.xlu0 %1022 }
 0x328   : > { %v1028_v51 = vsel %vm823_vm3, %v1023_v48, 0 }
 0x32a   : > { %v1073_v49 = vpop.permute.xlu1 %1072 }
 0x32b   : > { %v1078_v50 = vsel %vm823_vm3, %v1073_v49, 0  ;;  %2570 = vmatmul.mubr.msk.bf16.vlgmr.msra.gmra.mrb[12].mxu0 %vm823_vm3, %v3096_v22  ;;  %v1123_v53 = vpop.permute.xlu0 %1122 }
 0x32c   : > { %2564 = vmatmul.mubr.msk.bf16.vlgmr.msra.gmra.mrb[0].mxu1 %vm823_vm3, %v3098_v23  ;;  %2580 = vmatpush3.bf16.xpose.msra.mxu0 %v1078_v50  ;;  %v1128_v55 = vsel %vm823_vm3, %v1123_v53, 0 }
 0x32d   : > { %2574 = vmatpush3.bf16.xpose.msra.mxu1 %v1028_v51  ;;  %2581 = vmatprep.mubr.msk.bf16.mxu0 %vm2877_vm2, %v2874_v11 }
 0x32e   : > { %2575 = vmatprep.mubr.msk.bf16.mxu1 %vm2877_vm2, %v2874_v11  ;;  %2591 = vmatprep.subr.bf16.mxu0 %v2874_v11  ;;  %v1173_v52 = vpop.permute.xlu1 %1172 }
 0x32f   : > { %2585 = vmatprep.subr.bf16.mxu1 %v2874_v11  ;;  %v1178_v54 = vsel %vm823_vm3, %v1173_v52, 0 }
 0x333   : > { %2582 = vmatmul.mubr.msk.bf16.vlgmr.msra.gmra.mrb[16].mxu0 %vm823_vm3, %v3109_v36 }
 0x334   : > { %2576 = vmatmul.mubr.msk.bf16.vlgmr.msra.gmra.mrb[4].mxu1 %vm823_vm3, %v3104_v28  ;;  %2592 = vmatpush3.bf16.xpose.msra.mxu0 %v1178_v54 }
 0x335   : > { %2586 = vmatpush3.bf16.xpose.msra.mxu1 %v1128_v55  ;;  %2593 = vmatprep.mubr.msk.bf16.mxu0 %vm2877_vm2, %v2874_v11 }
 0x336   : > { %2587 = vmatprep.mubr.msk.bf16.mxu1 %vm2877_vm2, %v2874_v11  ;;  %2603 = vmatprep.subr.bf16.mxu0 %v2874_v11 }
 0x337   : > { %2597 = vmatprep.subr.bf16.mxu1 %v2874_v11 }
 0x33b   : > { %2594 = vmatmul.mubr.msk.bf16.vlgmr.msra.gmra.mrb[20].mxu0 %vm823_vm3, %v3118_v41 }
 0x33c   : > { %2588 = vmatmul.mubr.msk.bf16.vlgmr.msra.gmra.mrb[8].mxu1 %vm823_vm3, %v3111_v37  ;;  %2605 = vmatprep.mubr.msk.bf16.mxu0 %vm2877_vm2, %v2874_v11 }
 0x33d   : > { %2599 = vmatprep.mubr.msk.bf16.mxu1 %vm2877_vm2, %v2874_v11 }
 0x390   : > { %v864_v60 = vpop.f32.mrb[4].mxu0 }
 0x391   : > { %v1221_v63 = vmul.f32 0.35355338, %v864_v60  ;;  %v2553_v0 = vpop.f32.mrb[5].mxu0 }
 0x392   : > { %v867_v1 = vpop.f32.mrb[6].mxu0 }
 0x393   : > { %v1222_v3 = vmul.f32 0.35355338, %v867_v1  ;;  %v2554_v4 = vpop.f32.mrb[7].mxu0  ;;  %v3173_v5 = vadd.f32 %v3168_v62, %v1221_v63 }
 0x395   : > { %v1263_v6 = vsel %vm1262_vm6, %v3173_v5, -inf  ;;  %v3178_v7 = vadd.f32 %v3170_v2, %v1222_v3 }
 0x396   : > { %1264 = vmax.xlane.f32.xlu0 %v1263_v6 }
 0x397   : > { %v1266_v8 = vsel %vm1262_vm6, %v3178_v7, -inf }
 0x398   : > { %1267 = vmax.xlane.f32.xlu1 %v1266_v8  ;;  %v914_v9 = vpop.f32.mrb[8].mxu0 }
 0x399   : > { %v1223_v10 = vmul.f32 0.35355338, %v914_v9  ;;  %v2559_v12 = vpop.f32.mrb[9].mxu0 }
 0x39a   : > { %v917_v14 = vpop.f32.mrb[10].mxu0 }
 0x39b   : > { %v1224_v16 = vmul.f32 0.35355338, %v917_v14  ;;  %v2560_v17 = vpop.f32.mrb[11].mxu0  ;;  %v3183_v18 = vadd.f32 %v3168_v62, %v1223_v10 }
 0x39d   : > { %v1269_v19 = vsel %vm1262_vm6, %v3183_v18, -inf  ;;  %v3188_v20 = vadd.f32 %v3170_v2, %v1224_v16 }
 0x39e   : > { %1270 = vmax.xlane.f32.xlu0 %v1269_v19 }
 0x39f   : > { %v1272_v21 = vsel %vm1262_vm6, %v3188_v20, -inf }
 0x3a2   : > { %1273 = vmax.xlane.f32.xlu0 %v1272_v21 }
 0x3fe   : > { %v1014_v24 = vpop.f32.mrb[12].mxu0 }
 0x3ff   : > { %v1227_v25 = vmul.f32 0.35355338, %v1014_v24  ;;  %v964_v26 = vpop.f32.mrb[0].mxu1  ;;  %v2571_v27 = vpop.f32.mrb[13].mxu0 }
 0x400   : > { %v1225_v29 = vmul.f32 0.35355338, %v964_v26  ;;  %v2565_v30 = vpop.f32.mrb[1].mxu1  ;;  %v1017_v31 = vpop.f32.mrb[14].mxu0 }
 0x401   : > { %v1228_v32 = vmul.f32 0.35355338, %v1017_v31  ;;  %v967_v33 = vpop.f32.mrb[2].mxu1  ;;  %v2572_v34 = vpop.f32.mrb[15].mxu0  ;;  %v3193_v35 = vadd.f32 %v3168_v62, %v1227_v25 }
 0x402   : > { %v1226_v38 = vmul.f32 0.35355338, %v967_v33  ;;  %v2566_v39 = vpop.f32.mrb[3].mxu1  ;;  %v3201_v43 = vadd.f32 %v3168_v62, %v1225_v29 }
 0x403   : > { %v1281_v40 = vsel %vm1262_vm6, %v3193_v35, -inf  ;;  %v3198_v42 = vadd.f32 %v3170_v2, %v1228_v32 }
 0x404   : > { %1282 = vmax.xlane.f32.xlu0 %v1281_v40  ;;  %v3206_v45 = vadd.f32 %v3170_v2, %v1226_v38  ;;  %v1275_v50 = vsel %vm1262_vm6, %v3201_v43, -inf }
 0x405   : > { %v1284_v44 = vsel %vm1262_vm6, %v3198_v42, -inf }
 0x406   : > { %1285 = vmax.xlane.f32.xlu1 %v1284_v44  ;;  %v1114_v46 = vpop.f32.mrb[16].mxu0  ;;  %v1278_v57 = vsel %vm1262_vm6, %v3206_v45, -inf }
 0x407   : > { %v1231_v47 = vmul.f32 0.35355338, %v1114_v46  ;;  %v1064_v48 = vpop.f32.mrb[4].mxu1  ;;  %v2583_v49 = vpop.f32.mrb[17].mxu0 }
 0x408   : > { %v1229_v51 = vmul.f32 0.35355338, %v1064_v48  ;;  %v1117_v52 = vpop.f32.mrb[18].mxu0  ;;  %1276 = vmax.xlane.f32.xlu0 %v1275_v50  ;;  %v2577_v53 = vpop.f32.mrb[5].mxu1 }
 0x409   : > { %v1232_v54 = vmul.f32 0.35355338, %v1117_v52  ;;  %v1067_v55 = vpop.f32.mrb[6].mxu1  ;;  %v2584_v56 = vpop.f32.mrb[19].mxu0  ;;  %v3213_v58 = vadd.f32 %v3168_v62, %v1231_v47 }
 0x40a   : > { %v1230_v59 = vmul.f32 0.35355338, %v1067_v55  ;;  %1279 = vmax.xlane.f32.xlu1 %v1278_v57  ;;  %v2578_v60 = vpop.f32.mrb[7].mxu1  ;;  %v3221_v0 = vadd.f32 %v3168_v62, %v1229_v51 }
 0x40b   : > { %v1293_v61 = vsel %vm1262_vm6, %v3213_v58, -inf  ;;  %v3218_v63 = vadd.f32 %v3170_v2, %v1232_v54 }
 0x40c   : > { %1294 = vmax.xlane.f32.xlu0 %v1293_v61  ;;  %v3226_v3 = vadd.f32 %v3170_v2, %v1230_v59  ;;  %v1287_v10 = vsel %vm1262_vm6, %v3221_v0, -inf }
 0x40d   : > { %v1296_v1 = vsel %vm1262_vm6, %v3218_v63, -inf }
 0x40e   : > { %v1214_v4 = vpop.f32.mrb[20].mxu0  ;;  %1297 = vmax.xlane.f32.xlu1 %v1296_v1  ;;  %v1290_v21 = vsel %vm1262_vm6, %v3226_v3, -inf }
 0x40f   : > { %v1235_v6 = vmul.f32 0.35355338, %v1214_v4  ;;  %v1164_v8 = vpop.f32.mrb[8].mxu1  ;;  %v2595_v9 = vpop.f32.mrb[21].mxu0 }
 0x410   : > { %v1233_v12 = vmul.f32 0.35355338, %v1164_v8  ;;  %v1217_v14 = vpop.f32.mrb[22].mxu0  ;;  %1288 = vmax.xlane.f32.xlu0 %v1287_v10  ;;  %v2589_v16 = vpop.f32.mrb[9].mxu1 }
 0x411   : > { %v1167_v17 = vpop.f32.mrb[10].mxu1  ;;  %v2596_v19 = vpop.f32.mrb[23].mxu0  ;;  %v3233_v24 = vadd.f32 %v3168_v62, %v1235_v6  ;;  %v1236_v34 = vmul.f32 0.35355338, %v1217_v14 }
 0x412   : > { %1291 = vmax.xlane.f32.xlu1 %v1290_v21  ;;  %v2590_v25 = vpop.f32.mrb[11].mxu1  ;;  %v3238_v27 = vadd.f32 %v3168_v62, %v1233_v12 }
 0x413   : > { %v1305_v26 = vsel %vm1262_vm6, %v3233_v24, -inf }
 0x414   : > { %1306 = vmax.xlane.f32.xlu0 %v1305_v26  ;;  %v1299_v29 = vsel %vm1262_vm6, %v3238_v27, -inf }
 0x418   : > { %1300 = vmax.xlane.f32.xlu0 %v1299_v29 }
 0x423   : > { %1494 = vrot.lane.b32.xlu1 %v3084_v13, %s2881_s19  ;;  %v1265_v62 = vpop.xlane.xlu0 %1264 }
 0x424   : > { %v1311_v30 = vsub.f32 %v3173_v5, %v1265_v62 }
 0x426   : > { %v1327_v32 = vmul.f32 1.442695, %v1311_v30 }
 0x427   : > { %1541 = vrot.lane.b32.xlu1 %v3098_v23, %s2881_s19  ;;  %v1234_v23 = vmul.f32 0.35355338, %v1167_v17 }
 0x428   : > { %2782 = vpow2.f32 %v1327_v32 }
 0x42b   : > { %1588 = vrot.lane.b32.xlu1 %v3096_v22, %s2881_s19  ;;  %v1271_v31 = vpop.xlane.xlu0 %1270  ;;  %v3255_v22 = vadd.f32 %v3170_v2, %v1236_v34 }
 0x42c   : > { %v1313_v33 = vsub.f32 %v3183_v18, %v1271_v31 }
 0x42e   : > { %1447 = vrot.lane.b32.xlu0 %v3086_v15, %s2881_s19  ;;  %v1331_v13 = vmul.f32 1.442695, %v1313_v33  ;;  %v1308_v15 = vsel %vm1262_vm6, %v3255_v22, -inf }
 0x42f   : > { %v1274_v46 = vpop.xlane.xlu0 %1273 }
 0x430   : > { %2784 = vpow2.f32 %v1331_v13  ;;  %v1314_v48 = vsub.f32 %v3188_v20, %v1274_v46 }
 0x432   : > { %1635 = vrot.lane.b32.xlu0 %v3104_v28, %s2881_s19  ;;  %v3257_v38 = vpop.eup %2782  ;;  %v3262_v28 = vadd.f32 %v3170_v2, %v1234_v23  ;;  %v1268_v2 = vpop.xlane.xlu1 %1267  ;;  %v1333_v49 = vmul.f32 1.442695, %v1314_v48 }
 0x433   : > { %v1359_v5 = vsel %vm1262_vm6, %v3257_v38, 0.0  ;;  %v1312_v44 = vsub.f32 %v3178_v7, %v1268_v2 }
 0x434   : > { %v1302_v39 = vsel %vm1262_vm6, %v3262_v28, -inf }
 0x435   : > { %v1329_v47 = vmul.f32 1.442695, %v1312_v44 }
 0x437   : > { %2786 = vpow2.f32 %v1329_v47 }
 0x438   : > { %2788 = vpow2.f32 %v1333_v49 }
 0x43a   : > { %v3266_v18 = vpop.eup %2784 }
 0x43b   : > { %v1365_v40 = vsel %vm1262_vm6, %v3266_v18, 0.0 }
 0x441   : > { %v3276_v50 = vpop.eup %2786 }
 0x442   : > { %v1362_v51 = vsel %vm1262_vm6, %v3276_v50, 0.0  ;;  %v3280_v52 = vpop.eup %2788 }
 0x44f   : > { %1309 = vmax.xlane.f32.xlu1 %v1308_v15 }
 0x451   : > { %1360 = vadd.xlane.f32.xlu0 %v1359_v5 }
 0x453   : > { %1303 = vmax.xlane.f32.xlu1 %v1302_v39 }
 0x455   : > { %1366 = vadd.xlane.f32.xlu0 %v1365_v40 }
 0x464   : > { %1682 = vrot.lane.b32.xlu1 %v3109_v36, %s2881_s19  ;;  %v1368_v36 = vsel %vm1262_vm6, %v3280_v52, 0.0 }
 0x488   : > { %1363 = vadd.xlane.f32.xlu1 %v1362_v51 }
 0x48c   : > { %1369 = vadd.xlane.f32.xlu1 %v1368_v36 }
 0x491   : > { %v1283_v7 = vpop.xlane.xlu0 %1282 }
 0x492   : > { %v1317_v53 = vsub.f32 %v3193_v35, %v1283_v7 }
 0x493   : > { %v1286_v54 = vpop.xlane.xlu1 %1285 }
 0x494   : > { %v1339_v20 = vmul.f32 1.442695, %v1317_v53  ;;  %v1318_v55 = vsub.f32 %v3198_v42, %v1286_v54 }
 0x495   : > { %v1277_v56 = vpop.xlane.xlu0 %1276 }
 0x496   : > { %2790 = vpow2.f32 %v1339_v20  ;;  %v1341_v57 = vmul.f32 1.442695, %v1318_v55  ;;  %v1315_v59 = vsub.f32 %v3201_v43, %v1277_v56 }
 0x497   : > { %v1280_v60 = vpop.xlane.xlu1 %1279 }
 0x498   : > { %2792 = vpow2.f32 %v1341_v57  ;;  %v1335_v61 = vmul.f32 1.442695, %v1315_v59  ;;  %v1316_v1 = vsub.f32 %v3206_v45, %v1280_v60 }
 0x499   : > { %v1295_v4 = vpop.xlane.xlu0 %1294 }
 0x49a   : > { %2794 = vpow2.f32 %v1335_v61  ;;  %v1337_v6 = vmul.f32 1.442695, %v1316_v1  ;;  %v1321_v8 = vsub.f32 %v3213_v58, %v1295_v4 }
 0x49b   : > { %v1298_v35 = vpop.xlane.xlu1 %1297 }
 0x49c   : > { %2796 = vpow2.f32 %v1337_v6  ;;  %v1347_v9 = vmul.f32 1.442695, %v1321_v8  ;;  %v1322_v42 = vsub.f32 %v3218_v63, %v1298_v35 }
 0x49d   : > { %v1289_v10 = vpop.xlane.xlu0 %1288 }
 0x49e   : > { %2798 = vpow2.f32 %v1347_v9  ;;  %v1349_v12 = vmul.f32 1.442695, %v1322_v42  ;;  %v1319_v43 = vsub.f32 %v3221_v0, %v1289_v10 }
 0x49f   : > { %v1292_v14 = vpop.xlane.xlu1 %1291 }
 0x4a0   : > { %v3291_v16 = vpop.eup %2790  ;;  %2800 = vpow2.f32 %v1349_v12  ;;  %v1343_v45 = vmul.f32 1.442695, %v1319_v43  ;;  %v1320_v17 = vsub.f32 %v3226_v3, %v1292_v14 }
 0x4a1   : > { %v1307_v19 = vpop.xlane.xlu0 %1306  ;;  %v1377_v58 = vsel %vm1262_vm6, %v3291_v16, 0.0 }
 0x4a2   : > { %v3296_v21 = vpop.eup %2792  ;;  %2802 = vpow2.f32 %v1343_v45  ;;  %v1345_v63 = vmul.f32 1.442695, %v1320_v17  ;;  %v1325_v25 = vsub.f32 %v3233_v24, %v1307_v19  ;;  %1378 = vadd.xlane.f32.xlu0 %v1377_v58 }
 0x4a3   : > { %v1495_v26 = vpop.permute.xlu1 %1494  ;;  %v1380_v0 = vsel %vm1262_vm6, %v3296_v21, 0.0 }
 0x4a4   : > { %v3301_v29 = vpop.eup %2794  ;;  %2804 = vpow2.f32 %v1345_v63  ;;  %v1355_v62 = vmul.f32 1.442695, %v1325_v25  ;;  %2604 = vmatpush3.bf16.msra.mxu0 %v1495_v26  ;;  %1381 = vadd.xlane.f32.xlu1 %v1380_v0 }
 0x4a5   : > { %v1301_v3 = vpop.xlane.xlu0 %1300  ;;  %v1371_v30 = vsel %vm1262_vm6, %v3301_v29, 0.0  ;;  %2615 = vmatprep.subr.bf16.mxu0 %v2874_v11 }
 0x4a6   : > { %v3306_v31 = vpop.eup %2796  ;;  %2806 = vpow2.f32 %v1355_v62  ;;  %v1323_v24 = vsub.f32 %v3238_v27, %v1301_v3  ;;  %1372 = vadd.xlane.f32.xlu0 %v1371_v30 }
 0x4a7   : > { %v1374_v32 = vsel %vm1262_vm6, %v3306_v31, 0.0  ;;  %v1542_v49 = vpop.permute.xlu1 %1541 }
 0x4a8   : > { %v3311_v33 = vpop.eup %2798  ;;  %v1351_v13 = vmul.f32 1.442695, %v1323_v24  ;;  %1375 = vadd.xlane.f32.xlu1 %v1374_v32 }
 0x4a9   : > { %v1448_v34 = vpop.permute.xlu0 %1447  ;;  %v1389_v23 = vsel %vm1262_vm6, %v3311_v33, 0.0 }
 0x4aa   : > { %v3315_v15 = vpop.eup %2800  ;;  %2808 = vpow2.f32 %v1351_v13  ;;  %1390 = vadd.xlane.f32.xlu0 %v1389_v23  ;;  %2598 = vmatpush3.bf16.msra.mxu1 %v1448_v34 }
 0x4ab   : > { %v1392_v27 = vsel %vm1262_vm6, %v3315_v15, 0.0  ;;  %2609 = vmatprep.subr.bf16.mxu1 %v2874_v11  ;;  %v1589_v51 = vpop.permute.xlu1 %1588 }
 0x4ac   : > { %v3320_v5 = vpop.eup %2802  ;;  %1393 = vadd.xlane.f32.xlu1 %v1392_v27 }
 0x4ad   : > { %v1383_v39 = vsel %vm1262_vm6, %v3320_v5, 0.0 }
 0x4ae   : > { %v3324_v40 = vpop.eup %2804  ;;  %1384 = vadd.xlane.f32.xlu0 %v1383_v39 }
 0x4af   : > { %v1386_v2 = vsel %vm1262_vm6, %v3324_v40, 0.0 }
 0x4b0   : > { %v3328_v44 = vpop.eup %2806  ;;  %1387 = vadd.xlane.f32.xlu1 %v1386_v2 }
 0x4b1   : > { %v1401_v46 = vsel %vm1262_vm6, %v3328_v44, 0.0 }
 0x4b2   : > { %1402 = vadd.xlane.f32.xlu0 %v1401_v46 }
 0x4b4   : > { %v3332_v47 = vpop.eup %2808 }
 0x4b5   : > { %v1395_v48 = vsel %vm1262_vm6, %v3332_v47, 0.0 }
 0x4b6   : > { %1396 = vadd.xlane.f32.xlu0 %v1395_v48 }
 0x4cc   : > { %1729 = vrot.lane.b32.xlu0 %v3111_v37, %s2881_s19 }
 0x4dc   : > { %v1310_v36 = vpop.xlane.xlu1 %1309 }
 0x4dd   : > { %v1326_v7 = vsub.f32 %v3255_v22, %v1310_v36  ;;  %v3350_v22 = vpop.permute.xlu0 %1635 }
 0x4df   : > { %v1357_v53 = vmul.f32 1.442695, %v1326_v7 }
 0x4e0   : > { %v1304_v54 = vpop.xlane.xlu1 %1303 }
 0x4e1   : > { %2810 = vpow2.f32 %v1357_v53  ;;  %v1324_v20 = vsub.f32 %v3262_v28, %v1304_v54  ;;  %v1361_v28 = vpop.xlane.xlu0 %1360 }
 0x4e3   : > { %v1353_v55 = vmul.f32 1.442695, %v1324_v20 }
 0x4e4   : > { %v1683_v60 = vpop.permute.xlu1 %1682 }
 0x4e5   : > { %2812 = vpow2.f32 %v1353_v55  ;;  %v1367_v61 = vpop.xlane.xlu0 %1366 }
 0x4e6   : > { %2814 = vrcp.f32 %v1361_v28 }
 0x4eb   : > { %v3340_v56 = vpop.eup %2810 }
 0x4ec   : > { %v1404_v57 = vsel %vm1262_vm6, %v3340_v56, 0.0 }
 0x4ed   : > { %1405 = vadd.xlane.f32.xlu1 %v1404_v57 }
 0x4ef   : > { %v3344_v59 = vpop.eup %2812 }
 0x4f0   : > { %v1398_v37 = vsel %vm1262_vm6, %v3344_v59, 0.0  ;;  %v2815_v6 = vpop.eup %2814 }
 0x4f1   : > { %1399 = vadd.xlane.f32.xlu1 %v1398_v37  ;;  %v1423_v35 = vmul.f32 %v2815_v6, %v3257_v38 }
 0x502   : > { %1776 = vrot.lane.b32.xlu1 %v3118_v41, %s2881_s19 }
 0x515   : > { %v1364_v1 = vpop.xlane.xlu1 %1363 }
 0x516   : > { %2816 = vrcp.f32 %v1364_v1 }
 0x517   : > { %2818 = vrcp.f32 %v1367_v61 }
 0x519   : > { %v1370_v4 = vpop.xlane.xlu1 %1369 }
 0x51a   : > { %2820 = vrcp.f32 %v1370_v4 }
 0x520   : > { %v2817_v8 = vpop.eup %2816 }
 0x521   : > { %v1424_v9 = vmul.f32 %v2817_v8, %v3276_v50  ;;  %v2819_v42 = vpop.eup %2818 }
 0x522   : > { %v1425_v12 = vmul.f32 %v2819_v42, %v3266_v18 }
 0x523   : > { %v1439_v10 = vpack.c.bf16 %v1424_v9, %v1423_v35 }
 0x524   : > { %v2821_v41 = vpop.eup %2820 }
 0x525   : > { %v1426_v43 = vmul.f32 %v2821_v41, %v3280_v52  ;;  %2600 = vmatmul.mubr.msk.bf16.vlgmr.msra.gmra.mrb[12].mxu1 %vm1262_vm6, %v1439_v10 }
 0x526   : > { %2610 = vmatpush3.bf16.msra.mxu1 %v1542_v49  ;;  %2611 = vmatprep.mubr.msk.bf16.mxu1 %vm2877_vm2, %v2874_v11 }
 0x527   : > { %v1440_v14 = vpack.c.bf16 %v1426_v43, %v1425_v12  ;;  %2621 = vmatprep.subr.bf16.mxu1 %v2874_v11 }
 0x529   : > { %2606 = vmatmul.mubr.msk.bf16.vlgmr.msra.gmra.mrb[24].mxu0 %vm1262_vm6, %v1440_v14 }
 0x52a   : > { %2616 = vmatpush3.bf16.msra.mxu0 %v1589_v51  ;;  %2617 = vmatprep.mubr.msk.bf16.mxu0 %vm2877_vm2, %v2874_v11 }
 0x52b   : > { %2627 = vmatprep.subr.bf16.mxu0 %v2874_v11 }
 0x52f   : > { %v1379_v38 = vpop.xlane.xlu0 %1378 }
 0x530   : > { %2822 = vrcp.f32 %v1379_v38 }
 0x531   : > { %v1382_v18 = vpop.xlane.xlu1 %1381 }
 0x532   : > { %2824 = vrcp.f32 %v1382_v18 }
 0x533   : > { %v1373_v50 = vpop.xlane.xlu0 %1372 }
 0x534   : > { %2826 = vrcp.f32 %v1373_v50 }
 0x535   : > { %v1376_v52 = vpop.xlane.xlu1 %1375 }
 0x536   : > { %2828 = vrcp.f32 %v1376_v52 }
 0x537   : > { %v1391_v45 = vpop.xlane.xlu0 %1390 }
 0x538   : > { %2830 = vrcp.f32 %v1391_v45 }
 0x539   : > { %v1394_v17 = vpop.xlane.xlu1 %1393 }
 0x53a   : > { %v2823_v19 = vpop.eup %2822  ;;  %2832 = vrcp.f32 %v1394_v17 }
 0x53b   : > { %v1385_v58 = vpop.xlane.xlu0 %1384  ;;  %v1429_v25 = vmul.f32 %v2823_v19, %v3291_v16 }
 0x53c   : > { %v2825_v63 = vpop.eup %2824  ;;  %2834 = vrcp.f32 %v1385_v58 }
 0x53d   : > { %v1430_v26 = vmul.f32 %v2825_v63, %v3296_v21  ;;  %v1388_v0 = vpop.xlane.xlu1 %1387  ;;  %v2762_v63 = vld [vmem:[%s3539_s17] sm:$0xff]  }
 0x53e   : > { %v2827_v62 = vpop.eup %2826  ;;  %2836 = vrcp.f32 %v1388_v0 }
 0x53f   : > { %v1442_v3 = vpack.c.bf16 %v1430_v26, %v1429_v25  ;;  %v1427_v24 = vmul.f32 %v2827_v62, %v3301_v29  ;;  %v1403_v13 = vpop.xlane.xlu0 %1402  ;;  %v2763_v25 = vld [vmem:[%s3539_s17 + $0x8] sm:$0xff]  }
 0x540   : > { %v2829_v30 = vpop.eup %2828  ;;  %2838 = vrcp.f32 %v1403_v13 }
 0x541   : > { %v1428_v32 = vmul.f32 %v2829_v30, %v3306_v31  ;;  %2618 = vmatmul.mubr.msk.bf16.vlgmr.msra.gmra.mrb[28].mxu0 %vm1262_vm6, %v1442_v3 }
 0x542   : > { %v2831_v34 = vpop.eup %2830  ;;  %2628 = vmatpush3.bf16.msra.mxu0 %v1683_v60  ;;  %2629 = vmatprep.mubr.msk.bf16.mxu0 %vm2877_vm2, %v2874_v11 }
 0x543   : > { %v1441_v16 = vpack.c.bf16 %v1428_v32, %v1427_v24  ;;  %2639 = vmatprep.subr.bf16.mxu0 %v2874_v11  ;;  %v1433_v23 = vmul.f32 %v2831_v34, %v3311_v33  ;;  %v1397_v31 = vpop.xlane.xlu0 %1396 }
 0x544   : > { %v2833_v21 = vpop.eup %2832 }
 0x545   : > { %v1434_v27 = vmul.f32 %v2833_v21, %v3315_v15  ;;  %2612 = vmatmul.mubr.msk.bf16.vlgmr.msra.gmra.mrb[16].mxu1 %vm1262_vm6, %v1441_v16 }
 0x546   : > { %v2835_v29 = vpop.eup %2834  ;;  %2622 = vmatpush3.bf16.msra.mxu1 %v3350_v22  ;;  %2623 = vmatprep.mubr.msk.bf16.mxu1 %vm2877_vm2, %v2874_v11 }
 0x547   : > { %v1444_v39 = vpack.c.bf16 %v1434_v27, %v1433_v23  ;;  %2633 = vmatprep.subr.bf16.mxu1 %v2874_v11  ;;  %v1431_v46 = vmul.f32 %v2835_v29, %v3320_v5  ;;  %v1730_v15 = vpop.permute.xlu0 %1729 }
 0x548   : > { %v2837_v2 = vpop.eup %2836 }
 0x549   : > { %v1432_v48 = vmul.f32 %v2837_v2, %v3324_v40  ;;  %2630 = vmatmul.mubr.msk.bf16.vlgmr.msra.gmra.mrb[32].mxu0 %vm1262_vm6, %v1444_v39 }
 0x54a   : > { %2641 = vmatprep.mubr.msk.bf16.mxu0 %vm2877_vm2, %v2874_v11  ;;  %v2839_v51 = vpop.eup %2838 }
 0x54b   : > { %v1443_v33 = vpack.c.bf16 %v1432_v48, %v1431_v46  ;;  %v1437_v7 = vmul.f32 %v2839_v51, %v3328_v44 }
 0x54d   : > { %2624 = vmatmul.mubr.msk.bf16.vlgmr.msra.gmra.mrb[20].mxu1 %vm1262_vm6, %v1443_v33 }
 0x54e   : > { %2634 = vmatpush3.bf16.msra.mxu1 %v1730_v15  ;;  %2635 = vmatprep.mubr.msk.bf16.mxu1 %vm2877_vm2, %v2874_v11 }
 0x54f   : > { %2645 = vmatprep.subr.bf16.mxu1 %v2762_v63 }
 0x57a   : > { %v1406_v49 = vpop.xlane.xlu1 %1405 }
 0x57b   : > { %2840 = vrcp.f32 %v1406_v49 }
 0x57c   : > { %2842 = vrcp.f32 %v1397_v31 }
 0x57e   : > { %v1400_v5 = vpop.xlane.xlu1 %1399 }
 0x57f   : > { %2844 = vrcp.f32 %v1400_v5 }
 0x582   : > { %v1777_v40 = vpop.permute.xlu1 %1776 }
 0x583   : > { %2640 = vmatpush3.bf16.msra.mxu0 %v1777_v40 }
 0x585   : > { %v2841_v36 = vpop.eup %2840 }
 0x586   : > { %v1438_v53 = vmul.f32 %v2841_v36, %v3340_v56  ;;  %v2843_v54 = vpop.eup %2842 }
 0x587   : > { %v1435_v57 = vmul.f32 %v2843_v54, %v3332_v47 }
 0x588   : > { %v1446_v20 = vpack.c.bf16 %v1438_v53, %v1437_v7 }
 0x589   : > { %v2845_v55 = vpop.eup %2844 }
 0x58a   : > { %v1436_v11 = vmul.f32 %v2845_v55, %v3344_v59  ;;  %2642 = vmatmul.mubr.msk.bf16.vlgmr.msra.gmra.mrb[36].mxu0 %vm1262_vm6, %v1446_v20 }
 0x58c   : > { %v1445_v37 = vpack.c.bf16 %v1436_v11, %v1435_v57 }
 0x58e   : > { %2636 = vmatmul.mubr.msk.bf16.vlgmr.msra.gmra.mrb[24].mxu1 %vm1262_vm6, %v1445_v37 }
 0x58f   : > { %2646 = vmatpush3.bf16.msra.mxu1 %v2762_v63 }
 0x590   : > { %2647 = vmatprep.subr.bf16.mxu1 %v2763_v25 }
 0x593   : > { %2648 = vmatpush3.bf16.msra.mxu1 %v2763_v25 }
 0x5f8   : > { %v3393_v22 = vpop.f32.mrb[12].mxu1 }
 0x5f9   : > { %v2601_v28 = vpop.f32.mrb[13].mxu1 }
 0x5fa   : > { %v3395_v60 = vpop.f32.mrb[14].mxu1 }
 0x5fb   : > { %v2602_v44 = vpop.f32.mrb[15].mxu1 }
 0x5fc   : > { %v1534_v61 = vpop.f32.mrb[24].mxu0 }
 0x5fd   : > { %v2607_v56 = vpop.f32.mrb[25].mxu0 }
 0x5fe   : > { %v1537_v1 = vpop.f32.mrb[26].mxu0 }
 0x5ff   : > { %v2608_v4 = vpop.f32.mrb[27].mxu0 }
 0x614   : > { %v1628_v6 = vpop.f32.mrb[28].mxu0 }
 0x615   : > { %v2619_v8 = vpop.f32.mrb[29].mxu0 }
 0x616   : > { %v1631_v47 = vpop.f32.mrb[30].mxu0 }
 0x617   : > { %v2730_v35 = vpack.i.bf16 %v1631_v47, %v1628_v6  ;;  %v2620_v59 = vpop.f32.mrb[31].mxu0 }
 0x618   : > { %v1581_v9 = vpop.f32.mrb[16].mxu1 }
 0x619   : > { %2731 = vrot.lane.b32.xlu1 %v2730_v35, %s2882_s21  ;;  %v2613_v42 = vpop.f32.mrb[17].mxu1 }
 0x61a   : > { %v1584_v10 = vpop.f32.mrb[18].mxu1 }
 0x61b   : > { %v2735_v41 = vpack.i.bf16 %v1584_v10, %v1581_v9  ;;  %v2614_v12 = vpop.f32.mrb[19].mxu1  ;;  %v2862_v10 = vld [vmem:[%s3524_s13] sm:$0xff] }
 0x61c   : > { %v1722_v43 = vpop.f32.mrb[32].mxu0 }
 0x61d   : > { %2736 = vrot.lane.b32.xlu0 %v2735_v41, %s2882_s21  ;;  %v2631_v14 = vpop.f32.mrb[33].mxu0 }
 0x61e   : > { %v1725_v38 = vpop.f32.mrb[34].mxu0 }
 0x61f   : > { %v2740_v18 = vpack.i.bf16 %v1725_v38, %v1722_v43  ;;  %v2632_v50 = vpop.f32.mrb[35].mxu0  ;;  %v2863_v43 = vld [vmem:[%s3524_s13 + $0x10] sm:$0xff] }
 0x620   : > { %v1675_v52 = vpop.f32.mrb[20].mxu1 }
 0x621   : > { %2741 = vrot.lane.b32.xlu1 %v2740_v18, %s2883_s22  ;;  %v2625_v45 = vpop.f32.mrb[21].mxu1  ;;  %v2864_v18 = vld [vmem:[%s3524_s13 + $0x8] sm:$0xff] }
 0x622   : > { %v1678_v17 = vpop.f32.mrb[22].mxu1 }
 0x623   : > { %v2745_v19 = vpack.i.bf16 %v1678_v17, %v1675_v52  ;;  %v2626_v58 = vpop.f32.mrb[23].mxu1  ;;  %v2865_v17 = vld [vmem:[%s3524_s13 + $0x18] sm:$0xff] }
 0x625   : > { %2746 = vrot.lane.b32.xlu0 %v2745_v19, %s2883_s22 }
 0x65d   : > { %v1816_v26 = vpop.f32.mrb[36].mxu0 }
 0x65e   : > { %v2643_v0 = vpop.f32.mrb[37].mxu0 }
 0x65f   : > { %v1819_v62 = vpop.f32.mrb[38].mxu0 }
 0x660   : > { %v2755_v3 = vpack.i.bf16 %v1819_v62, %v1816_v26  ;;  %v2644_v30 = vpop.f32.mrb[39].mxu0 }
 0x661   : > { %v1769_v24 = vpop.f32.mrb[24].mxu1 }
 0x662   : > { %2756 = vrot.lane.b32.xlu1 %v2755_v3, %s2884_s24  ;;  %v2637_v32 = vpop.f32.mrb[25].mxu1 }
 0x663   : > { %v1772_v13 = vpop.f32.mrb[26].mxu1 }
 0x664   : > { %v2750_v34 = vpack.i.bf16 %v1772_v13, %v1769_v24  ;;  %v2638_v16 = vpop.f32.mrb[27].mxu1 }
 0x666   : > { %2751 = vrot.lane.b32.xlu0 %v2750_v34, %s2884_s24 }
 0x68b   : > { %v2732_v21 = vpop.permute.xlu1 %2731 }
 0x68c   : > { %v2734_v29 = vunpack.i.h.bf16 %v2732_v21  ;;  %v2733_v31 = vunpack.i.l.bf16 %v2732_v21 }
 0x68e   : > { %v1874_v48 = vsel %vm823_vm3, %v1537_v1, %v2734_v29  ;;  %v1873_v33 = vsel %vm823_vm3, %v1534_v61, %v2733_v31 }
 0x68f   : > { %v2737_v23 = vpop.permute.xlu0 %2736 }
 0x690   : > { %v2739_v49 = vunpack.i.h.bf16 %v2737_v23  ;;  %v2738_v5 = vunpack.i.l.bf16 %v2737_v23 }
 0x692   : > { %v1872_v37 = vsel %vm823_vm3, %v3395_v60, %v2739_v49  ;;  %v1871_v28 = vsel %vm823_vm3, %v3393_v22, %v2738_v5  ;;  %v2460_v22 = vld [vmem:[%s3540_s25] ss:$0 sm:$0xff] }
 0x693   : > { %v2742_v27 = vpop.permute.xlu1 %2741 }
 0x694   : > { %v2744_v39 = vunpack.i.h.bf16 %v2742_v27  ;;  %v2743_v2 = vunpack.i.l.bf16 %v2742_v27 }
 0x696   : > { %v1878_v36 = vsel %vm1262_vm6, %v1874_v48, %v2744_v39  ;;  %v1877_v7 = vsel %vm1262_vm6, %v1873_v33, %v2743_v2  ;;  %v2764_v33 = vld [vmem:[%s3003_s3] sm:$0xff]  }
 0x697   : > { %v2747_v46 = vpop.permute.xlu0 %2746  ;;  %2653 = vmatprep.subr.bf16.mxu0 %v2764_v33 }
 0x698   : > { %v2749_v53 = vunpack.i.h.bf16 %v2747_v46  ;;  %v2748_v54 = vunpack.i.l.bf16 %v2747_v46  ;;  %2654 = vmatpush3.bf16.msra.mxu0 %v2764_v33 }
 0x69a   : > { %v1875_v56 = vsel %vm1262_vm6, %v1871_v28, %v2748_v54  ;;  %v1876_v1 = vsel %vm1262_vm6, %v1872_v37, %v2749_v53  ;;  %v2465_v28 = vld [vmem:[%s578_s2] ss:$0 sm:$0xff] }
 0x6d4   : > { %v2757_v15 = vpop.permute.xlu1 %2756 }
 0x6d5   : > { %v2759_v40 = vunpack.i.h.bf16 %v2757_v15  ;;  %v2758_v51 = vunpack.i.l.bf16 %v2757_v15  ;;  %v2765_v15 = vld [vmem:[%s3003_s3 + $0x8] sm:$0xff]  }
 0x6d6   : > { %2655 = vmatprep.subr.bf16.mxu0 %v2765_v15 }
 0x6d7   : > { %v1883_v20 = vsel %vm1879_vm7, %v1878_v36, %v2759_v40  ;;  %v1882_v55 = vsel %vm1879_vm7, %v1877_v7, %v2758_v51  ;;  %2656 = vmatpush3.bf16.msra.mxu0 %v2765_v15 }
 0x6d8   : > { %v1885_v57 = vpack.c.bf16 %v1883_v20, %v1882_v55  ;;  %v2752_v11 = vpop.permute.xlu0 %2751 }
 0x6d9   : > { %v2754_v44 = vunpack.i.h.bf16 %v2752_v11  ;;  %v2753_v61 = vunpack.i.l.bf16 %v2752_v11 }
 0x6db   : > { %v1880_v4 = vsel %vm1879_vm7, %v1875_v56, %v2753_v61  ;;  %v1881_v6 = vsel %vm1879_vm7, %v1876_v1, %v2754_v44 }
 0x6dc   : > { %v1884_v8 = vpack.c.bf16 %v1881_v6, %v1880_v4  ;;  %v2466_v6 = vld [vmem:[%s581_s20] ss:$0 sm:$0xff] }
 0x6de   : > { %2649 = vmatprep.mubr.msk.bf16.mxu1 %vm618_vm1, %v1884_v8 }
 0x6df   : > { %2650 = vmatmul.mubr.msk.bf16.vlgmr.msra.gmra.mrb[28].mxu1 %vm618_vm1, %v1885_v57 }
 0x7b2   : > { %v2651_v60 = vpop.f32.mrb[28].mxu1 }
 0x7b3   : > { %v1949_v47 = vpop.f32.mrb[29].mxu1  ;;  %v1958_v35 = vadd.f32 %v2651_v60, %v2460_v22 }
 0x7b4   : > { %v1950_v59 = vadd.f32 %v2460_v22, %v1949_v47  ;;  %v2652_v9 = vpop.f32.mrb[30].mxu1 }
 0x7b5   : > { %v1952_v42 = vpop.f32.mrb[31].mxu1  ;;  %v3428_v14 = vadd.f32 %v2863_v43, %v1958_v35  ;;  %v1961_v38 = vadd.f32 %v2652_v9, %v2460_v22 }
 0x7b6   : > { %v3423_v41 = vadd.f32 %v2862_v10, %v1950_v59  ;;  %v1953_v12 = vadd.f32 %v2460_v22, %v1952_v42 }
 0x7b7   : > { %v3442_v19 = vadd.f32 %v2865_v17, %v1961_v38  ;;  %v1976_v58 = vsel %vm618_vm1, %v3428_v14, 0.0  ;;  %v2769_v17 = vld [vmem:[%s3013_s14 + $0x18] sm:$0xff]  }
 0x7b8   : > { %v3433_v50 = vadd.f32 %v2864_v18, %v1953_v12  ;;  %v1970_v52 = vsel %vm618_vm1, %v3423_v41, 0.0  ;;  %v2766_v18 = vld [vmem:[%s3013_s14] sm:$0xff]  }
 0x7b9   : > { %1971 = vadd.xlane.f32.xlu0 %v1970_v52  ;;  %v1979_v63 = vsel %vm618_vm1, %v3442_v19, 0.0  ;;  %2661 = vmatprep.subr.bf16.mxu1 %v2766_v18  ;;  %v2767_v52 = vld [vmem:[%s3013_s14 + $0x8] sm:$0xff]  }
 0x7ba   : > { %v1973_v45 = vsel %vm618_vm1, %v3433_v50, 0.0  ;;  %2662 = vmatpush3.bf16.msra.mxu1 %v2766_v18 }
 0x7bb   : > { %1974 = vadd.xlane.f32.xlu1 %v1973_v45  ;;  %2663 = vmatprep.subr.bf16.mxu1 %v2767_v52  ;;  %v2768_v45 = vld [vmem:[%s3013_s14 + $0x10] sm:$0xff]  }
 0x7bd   : > { %1977 = vadd.xlane.f32.xlu0 %v1976_v58  ;;  %v2770_v58 = vld [vmem:[%s3013_s14 + $0x20] sm:$0xff]  }
 0x7be   : > { %2664 = vmatpush3.bf16.msra.mxu1 %v2767_v52 }
 0x7bf   : > { %2665 = vmatprep.subr.bf16.mxu1 %v2768_v45 }
 0x7c1   : > { %1980 = vadd.xlane.f32.xlu0 %v1979_v63  ;;  %v2771_v63 = vld [vmem:[%s3013_s14 + $0x28] sm:$0xff]  }
 0x7c2   : > { %2666 = vmatpush3.bf16.msra.mxu1 %v2768_v45 }
 0x7c3   : > { %2667 = vmatprep.subr.bf16.mxu1 %v2769_v17 }
 0x7c6   : > { %2668 = vmatpush3.bf16.msra.mxu1 %v2769_v17 }
 0x7c7   : > { %2669 = vmatprep.subr.bf16.mxu1 %v2770_v58 }
 0x7ca   : > { %2670 = vmatpush3.bf16.msra.mxu1 %v2770_v58 }
 0x7cb   : > { %2671 = vmatprep.subr.bf16.mxu1 %v2771_v63 }
 0x7ce   : > { %2672 = vmatpush3.bf16.msra.mxu1 %v2771_v63 }
 0x846   : > { %v1972_v25 = vpop.xlane.xlu0 %1971 }
 0x847   : > { %v1982_v26 = vmul.f32 0.03125, %v1972_v25  ;;  %v2772_v25 = vld [vmem:[%s3013_s14 + $0x30] sm:$0xff]  }
 0x848   : > { %v1975_v0 = vpop.xlane.xlu1 %1974  ;;  %2673 = vmatprep.subr.bf16.mxu1 %v2772_v25 }
 0x849   : > { %v1986_v62 = vsub.f32 %v3423_v41, %v1982_v26  ;;  %v1983_v3 = vmul.f32 0.03125, %v1975_v0  ;;  %v2773_v26 = vld [vmem:[%s3013_s14 + $0x38] sm:$0xff]   ;;  %2674 = vmatpush3.bf16.msra.mxu1 %v2772_v25  ;;  %v2467_v0 = vld [vmem:[%s589_s5] ss:$0 sm:$0xff] }
 0x84a   : > { %v1978_v30 = vpop.xlane.xlu0 %1977  ;;  %2675 = vmatprep.subr.bf16.mxu1 %v2773_v26 }
 0x84b   : > { %v1987_v24 = vsub.f32 %v3433_v50, %v1983_v3  ;;  %v1984_v32 = vmul.f32 0.03125, %v1978_v30  ;;  %v1990_v13 = vmul.f32 %v1986_v62, %v1986_v62 }
 0x84d   : > { %v1988_v34 = vsub.f32 %v3428_v14, %v1984_v32  ;;  %v1994_v16 = vsel %vm618_vm1, %v1990_v13, 0.0  ;;  %v1991_v21 = vmul.f32 %v1987_v24, %v1987_v24  ;;  %2676 = vmatpush3.bf16.msra.mxu1 %v2773_v26 }
 0x84e   : > { %1995 = vadd.xlane.f32.xlu0 %v1994_v16  ;;  %v1981_v23 = vpop.xlane.xlu0 %1980 }
 0x84f   : > { %v1985_v27 = vmul.f32 0.03125, %v1981_v23  ;;  %v1997_v29 = vsel %vm618_vm1, %v1991_v21, 0.0  ;;  %v1992_v31 = vmul.f32 %v1988_v34, %v1988_v34 }
 0x850   : > { %1998 = vadd.xlane.f32.xlu1 %v1997_v29 }
 0x851   : > { %v1989_v39 = vsub.f32 %v3442_v19, %v1985_v27  ;;  %v2000_v2 = vsel %vm618_vm1, %v1992_v31, 0.0 }
 0x852   : > { %2001 = vadd.xlane.f32.xlu0 %v2000_v2 }
 0x853   : > { %v1993_v46 = vmul.f32 %v1989_v39, %v1989_v39 }
 0x855   : > { %v2003_v48 = vsel %vm618_vm1, %v1993_v46, 0.0 }
 0x856   : > { %2004 = vadd.xlane.f32.xlu1 %v2003_v48 }
 0x8db   : > { %v1996_v49 = vpop.xlane.xlu0 %1995 }
 0x8dc   : > { %v2006_v5 = vmul.f32 0.03125, %v1996_v49 }
 0x8dd   : > { %v1999_v40 = vpop.xlane.xlu1 %1998 }
 0x8de   : > { %v2010_v51 = vadd.f32 1e-05, %v2006_v5  ;;  %v2007_v36 = vmul.f32 0.03125, %v1999_v40 }
 0x8df   : > { %v2002_v7 = vpop.xlane.xlu0 %2001 }
 0x8e0   : > { %2846 = vrsqrt.f32 %v2010_v51  ;;  %v2011_v53 = vadd.f32 1e-05, %v2007_v36  ;;  %v2008_v54 = vmul.f32 0.03125, %v2002_v7 }
 0x8e2   : > { %2848 = vrsqrt.f32 %v2011_v53  ;;  %v2012_v20 = vadd.f32 1e-05, %v2008_v54 }
 0x8e3   : > { %v2005_v55 = vpop.xlane.xlu1 %2004 }
 0x8e4   : > { %2850 = vrsqrt.f32 %v2012_v20  ;;  %v2009_v57 = vmul.f32 0.03125, %v2005_v55 }
 0x8e6   : > { %v2013_v11 = vadd.f32 1e-05, %v2009_v57 }
 0x8e8   : > { %2852 = vrsqrt.f32 %v2013_v11 }
 0x8ea   : > { %v2847_v37 = vpop.eup %2846 }
 0x8eb   : > { %v2018_v44 = vmul.f32 %v2847_v37, %v1986_v62 }
 0x8ec   : > { %v2849_v61 = vpop.eup %2848 }
 0x8ed   : > { %v2019_v56 = vmul.f32 %v2849_v61, %v1987_v24  ;;  %v2028_v1 = vmul.f32 %v2465_v28, %v2018_v44 }
 0x8ee   : > { %v2851_v4 = vpop.eup %2850 }
 0x8ef   : > { %v2020_v8 = vmul.f32 %v2851_v4, %v1988_v34  ;;  %v2029_v22 = vmul.f32 %v2465_v28, %v2019_v56  ;;  %v2038_v60 = vadd.f32 %v2466_v6, %v2028_v1 }
 0x8f1   : > { %v2039_v47 = vadd.f32 %v2466_v6, %v2029_v22  ;;  %v2030_v59 = vmul.f32 %v2465_v28, %v2020_v8 }
 0x8f2   : > { %v2853_v35 = vpop.eup %2852 }
 0x8f3   : > { %v2021_v9 = vmul.f32 %v2853_v35, %v1989_v39  ;;  %v2042_v42 = vpack.c.bf16 %v2039_v47, %v2038_v60  ;;  %v2040_v12 = vadd.f32 %v2466_v6, %v2030_v59 }
 0x8f5   : > { %v2031_v10 = vmul.f32 %v2465_v28, %v2021_v9  ;;  %2657 = vmatprep.mubr.msk.bf16.mxu0 %vm618_vm1, %v2042_v42  ;;  %v2472_v42 = vld [vmem:[%s597_s18] ss:$0 sm:$0xff] }
 0x8f7   : > { %v2041_v43 = vadd.f32 %v2466_v6, %v2031_v10 }
 0x8f9   : > { %v2043_v38 = vpack.c.bf16 %v2041_v43, %v2040_v12 }
 0x8fb   : > { %2658 = vmatmul.mubr.msk.bf16.vlgmr.msra.gmra.mrb[40].mxu0 %vm618_vm1, %v2043_v38 }
 0x9ce   : > { %v2659_v62 = vpop.f32.mrb[40].mxu0 }
 0x9cf   : > { %v2116_v3 = vadd.f32 %v2659_v62, %v2467_v0  ;;  %v2107_v30 = vpop.f32.mrb[41].mxu0 }
 0x9d0   : > { %v2108_v24 = vadd.f32 %v2467_v0, %v2107_v30  ;;  %v2660_v32 = vpop.f32.mrb[42].mxu0 }
 0x9d1   : > { %v2128_v13 = vmul.f32 0.044715, %v2116_v3  ;;  %v2119_v34 = vadd.f32 %v2660_v32, %v2467_v0  ;;  %v2110_v16 = vpop.f32.mrb[43].mxu0  ;;  %v2124_v61 = vmul.f32 0.5, %v2116_v3 }
 0x9d2   : > { %v2126_v21 = vmul.f32 0.044715, %v2108_v24  ;;  %v2111_v23 = vadd.f32 %v2467_v0, %v2110_v16  ;;  %v2122_v4 = vmul.f32 0.5, %v2108_v24 }
 0x9d3   : > { %v2132_v27 = vmul.f32 %v2128_v13, %v2116_v3  ;;  %v2129_v29 = vmul.f32 0.044715, %v2119_v34  ;;  %v2125_v56 = vmul.f32 0.5, %v2119_v34 }
 0x9d4   : > { %v2130_v31 = vmul.f32 %v2126_v21, %v2108_v24  ;;  %v2127_v39 = vmul.f32 0.044715, %v2111_v23  ;;  %v2123_v6 = vmul.f32 0.5, %v2111_v23 }
 0x9d5   : > { %v2136_v2 = vmul.f32 %v2132_v27, %v2116_v3  ;;  %v2133_v46 = vmul.f32 %v2129_v29, %v2119_v34 }
 0x9d6   : > { %v2134_v48 = vmul.f32 %v2130_v31, %v2108_v24  ;;  %v2131_v33 = vmul.f32 %v2127_v39, %v2111_v23 }
 0x9d7   : > { %v2140_v15 = vadd.f32 %v2136_v2, %v2116_v3  ;;  %v2137_v49 = vmul.f32 %v2133_v46, %v2119_v34 }
 0x9d8   : > { %v2135_v5 = vmul.f32 %v2131_v33, %v2111_v23  ;;  %v2138_v40 = vadd.f32 %v2134_v48, %v2108_v24 }
 0x9d9   : > { %v2144_v51 = vmul.f32 0.7978846, %v2140_v15  ;;  %v2141_v36 = vadd.f32 %v2137_v49, %v2119_v34 }
 0x9da   : > { %v2139_v7 = vadd.f32 %v2135_v5, %v2111_v23  ;;  %v2142_v53 = vmul.f32 0.7978846, %v2138_v40 }
 0x9db   : > { %2854 = vtanh.f32 %v2144_v51  ;;  %v2145_v54 = vmul.f32 0.7978846, %v2141_v36 }
 0x9dc   : > { %v2143_v20 = vmul.f32 0.7978846, %v2139_v7  ;;  %2856 = vtanh.f32 %v2142_v53 }
 0x9dd   : > { %2858 = vtanh.f32 %v2145_v54 }
 0x9de   : > { %2860 = vtanh.f32 %v2143_v20 }
 0x9e5   : > { %v2855_v55 = vpop.eup %2854 }
 0x9e6   : > { %v2857_v57 = vpop.eup %2856  ;;  %v2152_v11 = vadd.f32 1.0, %v2855_v55 }
 0x9e7   : > { %v2859_v37 = vpop.eup %2858  ;;  %v2150_v28 = vadd.f32 1.0, %v2857_v57 }
 0x9e8   : > { %v2861_v44 = vpop.eup %2860  ;;  %v2153_v1 = vadd.f32 1.0, %v2859_v37  ;;  %v2156_v22 = vmul.f32 %v2152_v11, %v2124_v61 }
 0x9e9   : > { %v2151_v8 = vadd.f32 1.0, %v2861_v44  ;;  %v2154_v47 = vmul.f32 %v2150_v28, %v2122_v4 }
 0x9ea   : > { %v2157_v60 = vmul.f32 %v2153_v1, %v2125_v56 }
 0x9eb   : > { %v2155_v35 = vmul.f32 %v2151_v8, %v2123_v6 }
 0x9ec   : > { %v2159_v59 = vpack.c.bf16 %v2157_v60, %v2156_v22 }
 0x9ed   : > { %v2158_v9 = vpack.c.bf16 %v2155_v35, %v2154_v47 }
 0x9ef   : > { %2677 = vmatprep.mubr.bf16.mxu1 %v2158_v9 }
 0x9f0   : > { %2678 = vmatmul.mubr.bf16.vlgmr.msra.gmra.mrb[32].mxu1 %v2159_v59 }
 0xac3   : > { %v2679_v10 = vpop.f32.mrb[32].mxu1 }
 0xac4   : > { %v2274_v12 = vadd.f32 %v2679_v10, %v2472_v42  ;;  %v2265_v43 = vpop.f32.mrb[33].mxu1 }
 0xac5   : > { %v2266_v38 = vadd.f32 %v2472_v42, %v2265_v43  ;;  %v2680_v18 = vpop.f32.mrb[34].mxu1 }
 0xac6   : > { %v2282_v52 = vadd.f32 %v2274_v12, %v3428_v14  ;;  %v2277_v45 = vadd.f32 %v2680_v18, %v2472_v42  ;;  %v2268_v17 = vpop.f32.mrb[35].mxu1 }
 0xac7   : > { %v2280_v58 = vadd.f32 %v2266_v38, %v3423_v41  ;;  %v2269_v63 = vadd.f32 %v2472_v42, %v2268_v17 }
 0xac8   : > { %2286 = vst.msk [vmem:[%s3524_s13 + $0x10] sm:$0xff] %vm618_vm1, %v2282_v52  ;;  %v2283_v25 = vadd.f32 %v2277_v45, %v3442_v19 }
 0xac9   : > { %2284 = vst.msk [vmem:[%s3524_s13] sm:$0xff] %vm618_vm1, %v2280_v58  ;;  %v2281_v26 = vadd.f32 %v2269_v63, %v3433_v50 }
 0xaca   : > { %2287 = vst.msk [vmem:[%s3524_s13 + $0x18] sm:$0xff] %vm618_vm1, %v2283_v25 }
 0xacb   : > { %2285 = vst.msk [vmem:[%s3524_s13 + $0x8] sm:$0xff] %vm618_vm1, %v2281_v26 }
 0xacc PF: > { %s3541_s23 = sld [smem:[#allocation2_spill]] }
 0xad2   : > { %s23_s25 = sadd.s32 1, %s3541_s23  }
 0xad3   : > { %p20_p5 = scmp.ge.s32.totalorder %s23_s25, 4  }
 0xad5   :  { %22 = sbr.rel (!%p20_p5) target bundleno = 4 (0x4), region = 135 }

</bundles_post_ra>
